<compile_context>
chip_gen: v6e
topology: v6e:2x2x1
jax: 0.10.0
libtpu: 0.0.40
codegen_flags: <defaults>
</compile_context>

<pallas_src>
import functools

import jax
import jax.numpy as jnp
from jax import lax
from jax.experimental import pallas as pl
from jax.experimental.pallas import tpu as pltpu


# ----------------------------- in-kernel math ------------------------------

def _gelu(x):
    # exact erf-based GELU == torch.nn.GELU() default
    return 0.5 * x * (1.0 + lax.erf(x * 0.7071067811865476))


def _leaky_relu(x):
    return jnp.where(x >= 0.0, x, 0.2 * x)


def _layer_norm(x, gamma, beta, eps=1e-5):
    mu = jnp.mean(x, axis=-1, keepdims=True)
    var = jnp.mean((x - mu) ** 2, axis=-1, keepdims=True)
    return (x - mu) * lax.rsqrt(var + eps) * gamma + beta


def chi_prediction_kernel(
    src_oh_ref, snk_oh_ref, node_src_ref, node_snk_ref, ea_ref,
    Wcat1_ref, bcat1_ref, Aall_ref, bA_ref,
    Wn2_ref, bn2_ref, Wn3_ref, bn3_ref,
    Wd1_ref, bd1_ref, Wd2_ref, bd2_ref,
    ln_g_ref, ln_b_ref, Wout_ref, bout_ref,
    nodes_out_ref, logits_out_ref,
    *, nd, nheads,
):
    f32 = jnp.float32
    # one-hots arrive as bf16 (halved HBM/VMEM traffic); promoted ONCE to f32 so
    # every gather/scatter matmul accumulates exactly like the f32 reference.
    src_oh = src_oh_ref[...].astype(f32)              # [E, N]
    snk_oh = snk_oh_ref[...].astype(f32)              # [E, N]
    node_src = node_src_ref[...]                      # [N, nd + chi]  = [bb | enc_chi]
    node_snk = node_snk_ref[...]                      # [N, nd + pc]   = [bb | prev_chi]
    ea = ea_ref[...]                                  # [E, ed]

    N = node_src.shape[0]
    dz = nheads * nd
    bb = node_src[:, :nd]                             # [N, nd]

    # ---- per-edge gathers (one-hot matmuls) and single concat --------------
    src_part = jnp.dot(src_oh, node_src, preferred_element_type=f32)   # [E, nd+chi]
    snk_part = jnp.dot(snk_oh, node_snk, preferred_element_type=f32)   # [E, nd+pc]
    cat = jnp.concatenate([src_part, snk_part, ea], axis=1)            # [E, F]

    # ---- fused first layer: all attention heads + neighbor-MLP layer 1 -----
    h0 = jnp.dot(cat, Wcat1_ref[...], preferred_element_type=f32) + bcat1_ref[...]
    z_att = _leaky_relu(h0[:, :dz])                                    # [E, H*nd]
    n1 = _gelu(h0[:, dz:])                                             # [E, nd]

    # per-head attention scores via a block-diagonal aA matmul -> [E, H]
    scores = jnp.dot(z_att, Aall_ref[...], preferred_element_type=f32) + bA_ref[...]

    # ---- neighbor node-update MLP (remaining layers) ------------------------
    n2 = _gelu(jnp.dot(n1, Wn2_ref[...], preferred_element_type=f32) + bn2_ref[...])
    neigh = jnp.dot(n2, Wn3_ref[...], preferred_element_type=f32) + bn3_ref[...]   # [E, nd]

    # ---- scatter-softmax over sink nodes (mask hoisted, per-edge ops batched)
    snk_mask = snk_oh > 0.5                            # [E, N] bool, reused by all heads
    NEG = jnp.float32(-3.4028235e38)                   # torch_scatter 'max' identity

    smax_cols = []
    for h in range(nheads):
        masked = jnp.where(snk_mask, scores[:, h:h + 1], NEG)            # [E, N]
        smax_n = jnp.max(masked, axis=0, keepdims=True)                  # [1, N]
        smax_n = jnp.where(smax_n <= -3.0e38, 0.0, smax_n)               # empty-group fill
        smax_cols.append(
            jnp.sum(jnp.where(snk_mask, smax_n, 0.0), axis=1, keepdims=True))  # [E, 1]
    smax_e = jnp.concatenate(smax_cols, axis=1)                          # [E, H]

    att = jnp.exp(scores - smax_e)                                       # [E, H]

    norm_cols = []
    for h in range(nheads):
        contrib = jnp.where(snk_mask, att[:, h:h + 1] + 1e-12, 0.0)      # [E, N]
        norm_n = jnp.sum(contrib, axis=0, keepdims=True)                 # [1, N]
        norm_cols.append(
            jnp.sum(jnp.where(snk_mask, norm_n, 0.0), axis=1, keepdims=True))   # [E, 1]
    norm_e = jnp.concatenate(norm_cols, axis=1)                          # [E, H]
    att = att * pl.reciprocal(norm_e, approx=False)                      # EUP reciprocal

    # ---- reference quirk: atten[:, eidx[1]] gathers along the *edge* axis with
    #      sink-node indices (< N <= E)  ->  snk_oh @ att[:N]   (no E x E matrix)
    att_q = jnp.dot(snk_oh, att[:N, :], preferred_element_type=f32)      # [E, H]

    # ---- head mean folded into the edge weight; ONE scatter matmul ----------
    w_edge = jnp.sum(att_q, axis=1, keepdims=True) * (1.0 / nheads)      # [E, 1]
    weighted = w_edge * neigh                                            # [E, nd]
    update = jnp.dot(snk_oh.T, weighted, preferred_element_type=f32)     # [N, nd]

    # ---- node update (reference reuses node_norm1 and the same residual) ----
    g = ln_g_ref[...]
    b = ln_b_ref[...]
    h1 = _layer_norm(bb + update, g, b)
    d1 = _gelu(jnp.dot(h1, Wd1_ref[...], preferred_element_type=f32) + bd1_ref[...])
    d2 = jnp.dot(d1, Wd2_ref[...], preferred_element_type=f32) + bd2_ref[...]
    h2 = _layer_norm(d2 + update, g, b)

    nodes_out_ref[...] = h2
    logits_out_ref[...] = (
        jnp.dot(h2, Wout_ref[...], preferred_element_type=f32) + bout_ref[...])


# ------------------------------ host wrappers --------------------------------

def chi_core_pallas(bb_nodes, prev_chi, enc_chi_flat, eidx, eattr, kp):
    N, nd = bb_nodes.shape
    E, _ = eattr.shape
    nheads = kp["nheads"]
    out_dim = kp["Wout"].shape[1]
    assert E >= N, "reference indexing atten[:, eidx[1]] requires E >= N"

    src_oh = jax.nn.one_hot(eidx[0], N, dtype=jnp.bfloat16)        # [E, N]
    snk_oh = jax.nn.one_hot(eidx[1], N, dtype=jnp.bfloat16)        # [E, N]
    node_src = jnp.concatenate([bb_nodes, enc_chi_flat], axis=1)   # [N, nd+chi]
    node_snk = jnp.concatenate([bb_nodes, prev_chi], axis=1)       # [N, nd+pc]

    inputs = (
        src_oh, snk_oh, node_src, node_snk, eattr,
        kp["Wcat1"], kp["bcat1"], kp["Aall"], kp["bA"],
        kp["Wn2"], kp["bn2"], kp["Wn3"], kp["bn3"],
        kp["Wd1"], kp["bd1"], kp["Wd2"], kp["bd2"],
        kp["ln_g"], kp["ln_b"], kp["Wout"], kp["bout"],
    )

    vmem = pl.BlockSpec(memory_space=pltpu.MemorySpace.VMEM)
    kernel = functools.partial(chi_prediction_kernel, nd=nd, nheads=nheads)
    nodes_out, logits = pl.pallas_call(
        kernel,
        out_shape=(jax.ShapeDtypeStruct((N, nd), jnp.float32),
                   jax.ShapeDtypeStruct((N, out_dim), jnp.float32)),
        in_specs=[vmem] * len(inputs),
        out_specs=(vmem, vmem),
    )(*inputs)
    return nodes_out, logits


def chi_prediction_forward(chi_angles, bb_nodes, prev_chi, edge_index, edge_attrs,
                           kp, rb, teacher_force=True):
    # host glue (mirrors the torch forward outside the neural core)
    keep = edge_index[0] != edge_index[1]              # drop self edges
    eidx = edge_index[:, keep]
    eattr = edge_attrs[keep]
    enc = jnp.nan_to_num(rb.compute_binned_degree_basis_function(chi_angles))
    enc_flat = enc.reshape(enc.shape[0], -1)

    nodes_out, logits = chi_core_pallas(bb_nodes, prev_chi, enc_flat, eidx, eattr, kp)

    pred_idx = jnp.argmax(logits, axis=-1)
    pred_angle = rb.index_to_degree_bin[pred_idx]
    if teacher_force:
        chi_index = prev_chi.shape[1] // rb.num_chi_bins
        gt = chi_angles[:, chi_index]
        enc_next = jnp.nan_to_num(
            rb.compute_binned_degree_basis_function(gt[:, None]))[:, 0]
    else:
        enc_next = jnp.nan_to_num(
            rb.compute_binned_degree_basis_function(pred_angle[:, None]))[:, 0]
    return jnp.concatenate([prev_chi, enc_next], axis=1), logits, pred_angle, nodes_out


# ----------------------- RotamerBuilder stand-in (host) ----------------------

class SimpleRotamerBuilder:
    # TODO(synk): stand-in for the external RotamerBuilder (RBF soft-binning).
    def __init__(self, num_chi_bins):
        self.num_chi_bins = num_chi_bins
        self.index_to_degree_bin = jnp.linspace(
            -180.0, 180.0 - 360.0 / num_chi_bins, num_chi_bins).astype(jnp.float32)

    def compute_binned_degree_basis_function(self, chi_angles):
        diff = chi_angles[..., None] - self.index_to_degree_bin
        diff = (diff + 180.0) % 360.0 - 180.0
        return jnp.exp(-(diff ** 2) / (2.0 * 30.0 ** 2))


# --------------------------- deterministic params ----------------------------

def init_params(key, nd, ed, chi, pc, out_dim, nheads):
    """Parameters in 'torch layout' (per-head linears, reference concat order)."""
    F = 2 * nd + chi + ed + pc

    def lin(k, fin, fout):
        k1, k2 = jax.random.split(k)
        W = 0.1 * jax.random.normal(k1, (fin, fout), jnp.float32)
        b = 0.05 * jax.random.normal(k2, (1, fout), jnp.float32)
        return W, b

    keys = iter(jax.random.split(key, 2 * nheads + 6))
    aW_W, aW_b, aA_w, aA_b = [], [], [], []
    for _ in range(nheads):
        W, b = lin(next(keys), F, nd)
        aW_W.append(W); aW_b.append(b)
    for _ in range(nheads):
        W, b = lin(next(keys), nd, 1)
        aA_w.append(W); aA_b.append(b)

    Wn1, bn1 = lin(next(keys), F, nd)
    Wn2, bn2 = lin(next(keys), nd, nd)
    Wn3, bn3 = lin(next(keys), nd, nd)
    Wd1, bd1 = lin(next(keys), nd, 4 * nd)
    Wd2, bd2 = lin(next(keys), 4 * nd, nd)
    Wout, bout = lin(next(keys), nd, out_dim)

    return dict(
        aW_W=jnp.stack(aW_W), aW_b=jnp.stack(aW_b),
        aA_w=jnp.stack(aA_w), aA_b=jnp.stack(aA_b),
        Wn1=Wn1, bn1=bn1, Wn2=Wn2, bn2=bn2, Wn3=Wn3, bn3=bn3,
        Wd1=Wd1, bd1=bd1, Wd2=Wd2, bd2=bd2,
        Wout=Wout, bout=bout,
        ln_g=jnp.ones((1, nd), jnp.float32), ln_b=jnp.zeros((1, nd), jnp.float32),
    )


def pack_params(p, nd, chi, ed, pc, nheads):
    """Repack torch-layout params into the fused / head-batched kernel layout."""
    # reference concat order: [src_emb | snk_emb | src_chi | eattr | prev_chi]
    # kernel    concat order: [src_emb | src_chi | snk_emb | prev_chi | eattr]
    perm = jnp.concatenate([
        jnp.arange(0, nd),                                        # src_emb
        jnp.arange(2 * nd, 2 * nd + chi),                         # src_chi
        jnp.arange(nd, 2 * nd),                                   # snk_emb
        jnp.arange(2 * nd + chi + ed, 2 * nd + chi + ed + pc),    # prev_chi (sink)
        jnp.arange(2 * nd + chi, 2 * nd + chi + ed),              # eattr
    ])

    WaW_all = jnp.concatenate([p["aW_W"][h] for h in range(nheads)], axis=1)[perm]
    baW_all = jnp.concatenate([p["aW_b"][h] for h in range(nheads)], axis=1)
    Wn1p = p["Wn1"][perm]
    Wcat1 = jnp.concatenate([WaW_all, Wn1p], axis=1)              # [F, H*nd + nd]
    bcat1 = jnp.concatenate([baW_all, p["bn1"]], axis=1)          # [1, H*nd + nd]

    Aall = jnp.zeros((nheads * nd, nheads), jnp.float32)          # block-diag aA
    for h in range(nheads):
        Aall = Aall.at[h * nd:(h + 1) * nd, h].set(p["aA_w"][h][:, 0])
    bA = jnp.concatenate([p["aA_b"][h].reshape(1, 1) for h in range(nheads)], axis=1)

    return dict(
        Wcat1=Wcat1, bcat1=bcat1, Aall=Aall, bA=bA,
        Wn2=p["Wn2"], bn2=p["bn2"], Wn3=p["Wn3"], bn3=p["bn3"],
        Wd1=p["Wd1"], bd1=p["bd1"], Wd2=p["Wd2"], bd2=p["bd2"],
        Wout=p["Wout"], bout=p["bout"],
        ln_g=p["ln_g"], ln_b=p["ln_b"],
    )


# ------------------------------ pure-JAX reference ---------------------------

def reference_forward(chi_angles, bb_nodes, prev_chi, edge_index, edge_attrs,
                      p, rb, nheads, teacher_force=True):
    def gelu(v): return 0.5 * v * (1.0 + lax.erf(v * 0.7071067811865476))
    def leaky(v): return jnp.where(v >= 0, v, 0.2 * v)
    def ln(v, g, b):
        mu = v.mean(-1, keepdims=True)
        var = ((v - mu) ** 2).mean(-1, keepdims=True)
        return (v - mu) / jnp.sqrt(var + 1e-5) * g + b

    keep = edge_index[0] != edge_index[1]
    eidx = edge_index[:, keep]
    eattr = edge_attrs[keep]
    src_i, snk_i = eidx[0], eidx[1]
    N = bb_nodes.shape[0]

    enc = jnp.nan_to_num(rb.compute_binned_degree_basis_function(chi_angles))
    enc_flat = enc.reshape(enc.shape[0], -1)

    x = jnp.concatenate([bb_nodes[src_i], bb_nodes[snk_i], enc_flat[src_i],
                         eattr, prev_chi[snk_i]], axis=1)

    neigh = gelu(x @ p["Wn1"] + p["bn1"])
    neigh = gelu(neigh @ p["Wn2"] + p["bn2"])
    neigh = neigh @ p["Wn3"] + p["bn3"]

    upds = []
    for h in range(nheads):
        z = leaky(x @ p["aW_W"][h] + p["aW_b"][h])
        s = (z @ p["aA_w"][h] + p["aA_b"][h])[:, 0]
        smax = jax.ops.segment_max(s, snk_i, num_segments=N)
        smax = jnp.where(jnp.isfinite(smax), smax, 0.0)
        att = jnp.exp(s - smax[snk_i])
        norm = jax.ops.segment_sum(att + 1e-12, snk_i, num_segments=N)
        att = att / norm[snk_i]
        att_q = att[snk_i]  # same indexing quirk as the reference module
        upds.append(jax.ops.segment_sum(att_q[:, None] * neigh, snk_i, num_segments=N))
    node_update = sum(upds) / nheads

    h1 = ln(bb_nodes + node_update, p["ln_g"], p["ln_b"])
    d = gelu(h1 @ p["Wd1"] + p["bd1"])
    d = d @ p["Wd2"] + p["bd2"]
    h2 = ln(d + node_update, p["ln_g"], p["ln_b"])

    logits = h2 @ p["Wout"] + p["bout"]
    pred_idx = jnp.argmax(logits, axis=-1)
    pred_angle = rb.index_to_degree_bin[pred_idx]
    if teacher_force:
        chi_index = prev_chi.shape[1] // rb.num_chi_bins
        gt = chi_angles[:, chi_index]
        enc_next = jnp.nan_to_num(
            rb.compute_binned_degree_basis_function(gt[:, None]))[:, 0]
    else:
        enc_next = jnp.nan_to_num(
            rb.compute_binned_degree_basis_function(pred_angle[:, None]))[:, 0]
    return jnp.concatenate([prev_chi, enc_next], axis=1), logits, pred_angle, h2


# ----------------------------------- main ------------------------------------

if __name__ == "__main__":
    node_dim, edge_dim = 32, 32
    num_chi_bins, n_chi = 32, 4
    chi_flat_dim = n_chi * num_chi_bins          # 128
    prev_chi_dim = num_chi_bins                  # one chi encoded so far -> chi_index = 1
    out_dim = num_chi_bins
    nheads = 2
    N, E = 16, 48

    key = jax.random.PRNGKey(0)
    k_par, k_nodes, k_eattr, k_chi, k_src, k_off, k_prev = jax.random.split(key, 7)

    params = init_params(k_par, node_dim, edge_dim, chi_flat_dim,
                         prev_chi_dim, out_dim, nheads)
    kparams = pack_params(params, node_dim, chi_flat_dim, edge_dim,
                          prev_chi_dim, nheads)
    kparams["nheads"] = nheads

    bb_nodes = jax.random.normal(k_nodes, (N, node_dim), jnp.float32)
    edge_attrs = jax.random.normal(k_eattr, (E, edge_dim), jnp.float32)
    chi_angles = jax.random.uniform(k_chi, (N, n_chi), jnp.float32, -180.0, 180.0)
    chi_angles = chi_angles.at[0, 3].set(jnp.nan)      # exercise nan_to_num path
    prev_chi = jax.random.normal(k_prev, (N, prev_chi_dim), jnp.float32)

    src = jax.random.randint(k_src, (E,), 0, N)
    off = jax.random.randint(k_off, (E,), 1, N)        # guarantees no self-edges
    snk = (src + off) % N
    edge_index = jnp.stack([src, snk]).astype(jnp.int32)

    rb = SimpleRotamerBuilder(num_chi_bins)

    outs = chi_prediction_forward(chi_angles, bb_nodes, prev_chi, edge_index,
                                  edge_attrs, kparams, rb, teacher_force=True)
    jax.block_until_ready(outs)

    refs = reference_forward(chi_angles, bb_nodes, prev_chi, edge_index,
                             edge_attrs, params, rb, nheads, teacher_force=True)

    new_prev_chi, logits, pred_angle, nodes_out = outs
    r_prev_chi, r_logits, r_angle, r_nodes = refs

    assert jnp.allclose(nodes_out, r_nodes, atol=2e-4, rtol=2e-4)
    assert jnp.allclose(logits, r_logits, atol=2e-4, rtol=2e-4)
    assert jnp.allclose(new_prev_chi, r_prev_chi, atol=2e-4, rtol=2e-4)

    print("KERNEL_OK")
</pallas_src>

<mosaic_0001>
module attributes {stable_mosaic.version = 11 : i64} {
  func.func @chi_prediction_kernel(%arg0: memref<48x16xbf16, #tpu.memory_space<vmem>>, %arg1: memref<48x16xbf16, #tpu.memory_space<vmem>>, %arg2: memref<16x160xf32, #tpu.memory_space<vmem>>, %arg3: memref<16x64xf32, #tpu.memory_space<vmem>>, %arg4: memref<48x32xf32, #tpu.memory_space<vmem>>, %arg5: memref<256x96xf32, #tpu.memory_space<vmem>>, %arg6: memref<1x96xf32, #tpu.memory_space<vmem>>, %arg7: memref<64x2xf32, #tpu.memory_space<vmem>>, %arg8: memref<1x2xf32, #tpu.memory_space<vmem>>, %arg9: memref<32x32xf32, #tpu.memory_space<vmem>>, %arg10: memref<1x32xf32, #tpu.memory_space<vmem>>, %arg11: memref<32x32xf32, #tpu.memory_space<vmem>>, %arg12: memref<1x32xf32, #tpu.memory_space<vmem>>, %arg13: memref<32x128xf32, #tpu.memory_space<vmem>>, %arg14: memref<1x128xf32, #tpu.memory_space<vmem>>, %arg15: memref<128x32xf32, #tpu.memory_space<vmem>>, %arg16: memref<1x32xf32, #tpu.memory_space<vmem>>, %arg17: memref<1x32xf32, #tpu.memory_space<vmem>>, %arg18: memref<1x32xf32, #tpu.memory_space<vmem>>, %arg19: memref<32x32xf32, #tpu.memory_space<vmem>>, %arg20: memref<1x32xf32, #tpu.memory_space<vmem>>, %arg21: memref<16x32xf32, #tpu.memory_space<vmem>>, %arg22: memref<16x32xf32, #tpu.memory_space<vmem>>) attributes {dimension_semantics = [], scalar_prefetch = 0 : i64, scratch_operands = 0 : i64, tpu.core_type = #tpu.core_type<tc>} {
    %c0 = arith.constant 0 : index
    %c0_0 = arith.constant 0 : index
    %0 = vector.load %arg0[%c0, %c0_0] : memref<48x16xbf16, #tpu.memory_space<vmem>>, vector<48x16xbf16>
    %1 = arith.extf %0 : vector<48x16xbf16> to vector<48x16xf32>
    %c0_1 = arith.constant 0 : index
    %c0_2 = arith.constant 0 : index
    %2 = vector.load %arg1[%c0_1, %c0_2] : memref<48x16xbf16, #tpu.memory_space<vmem>>, vector<48x16xbf16>
    %3 = arith.extf %2 : vector<48x16xbf16> to vector<48x16xf32>
    %c0_3 = arith.constant 0 : index
    %c0_4 = arith.constant 0 : index
    %4 = vector.load %arg2[%c0_3, %c0_4] : memref<16x160xf32, #tpu.memory_space<vmem>>, vector<16x160xf32>
    %c0_5 = arith.constant 0 : index
    %c0_6 = arith.constant 0 : index
    %5 = vector.load %arg3[%c0_5, %c0_6] : memref<16x64xf32, #tpu.memory_space<vmem>>, vector<16x64xf32>
    %c0_7 = arith.constant 0 : index
    %c0_8 = arith.constant 0 : index
    %6 = vector.load %arg4[%c0_7, %c0_8] : memref<48x32xf32, #tpu.memory_space<vmem>>, vector<48x32xf32>
    %7 = vector.extract_strided_slice %4 {offsets = [0, 0], sizes = [16, 32], strides = [1, 1]} : vector<16x160xf32> to vector<16x32xf32>
    %cst = arith.constant dense<0.000000e+00> : vector<48x160xf32>
    %8 = tpu.matmul %1, %4, %cst {dimension_numbers = #tpu.dot_dimension_numbers<[1], [0], [0], [1], [0, 0, 1, 1], [], []>} : vector<48x16xf32>, vector<16x160xf32>, vector<48x160xf32> -> vector<48x160xf32>
    %cst_9 = arith.constant dense<0.000000e+00> : vector<48x64xf32>
    %9 = tpu.matmul %3, %5, %cst_9 {dimension_numbers = #tpu.dot_dimension_numbers<[1], [0], [0], [1], [0, 0, 1, 1], [], []>} : vector<48x16xf32>, vector<16x64xf32>, vector<48x64xf32> -> vector<48x64xf32>
    %10 = tpu.concatenate %8, %9, %6 in 1 : vector<48x160xf32>, vector<48x64xf32>, vector<48x32xf32> -> vector<48x256xf32>
    %c0_10 = arith.constant 0 : index
    %c0_11 = arith.constant 0 : index
    %11 = vector.load %arg5[%c0_10, %c0_11] : memref<256x96xf32, #tpu.memory_space<vmem>>, vector<256x96xf32>
    %cst_12 = arith.constant dense<0.000000e+00> : vector<48x96xf32>
    %12 = tpu.matmul %10, %11, %cst_12 {dimension_numbers = #tpu.dot_dimension_numbers<[1], [0], [0], [1], [0, 0, 1, 1], [], []>} : vector<48x256xf32>, vector<256x96xf32>, vector<48x96xf32> -> vector<48x96xf32>
    %c0_13 = arith.constant 0 : index
    %c0_14 = arith.constant 0 : index
    %13 = vector.load %arg6[%c0_13, %c0_14] : memref<1x96xf32, #tpu.memory_space<vmem>>, vector<1x96xf32>
    %14 = vector.broadcast %13 : vector<1x96xf32> to vector<48x96xf32>
    %15 = arith.addf %12, %14 : vector<48x96xf32>
    %16 = vector.extract_strided_slice %15 {offsets = [0, 0], sizes = [48, 64], strides = [1, 1]} : vector<48x96xf32> to vector<48x64xf32>
    %cst_15 = arith.constant 0.000000e+00 : f32
    %17 = vector.broadcast %cst_15 : f32 to vector<48x64xf32>
    %18 = arith.cmpf oge, %16, %17 : vector<48x64xf32>
    %cst_16 = arith.constant 2.000000e-01 : f32
    %19 = vector.broadcast %cst_16 : f32 to vector<48x64xf32>
    %20 = arith.mulf %19, %16 : vector<48x64xf32>
    %21 = arith.select %18, %16, %20 : vector<48x64xi1>, vector<48x64xf32>
    %22 = vector.extract_strided_slice %15 {offsets = [0, 64], sizes = [48, 32], strides = [1, 1]} : vector<48x96xf32> to vector<48x32xf32>
    %cst_17 = arith.constant 5.000000e-01 : f32
    %23 = vector.broadcast %cst_17 : f32 to vector<48x32xf32>
    %24 = arith.mulf %23, %22 : vector<48x32xf32>
    %cst_18 = arith.constant 0.707106769 : f32
    %25 = vector.broadcast %cst_18 : f32 to vector<48x32xf32>
    %26 = arith.mulf %22, %25 : vector<48x32xf32>
    %27 = math.erf %26 : vector<48x32xf32>
    %cst_19 = arith.constant 1.000000e+00 : f32
    %28 = vector.broadcast %cst_19 : f32 to vector<48x32xf32>
    %29 = arith.addf %28, %27 : vector<48x32xf32>
    %30 = arith.mulf %24, %29 : vector<48x32xf32>
    %c0_20 = arith.constant 0 : index
    %c0_21 = arith.constant 0 : index
    %31 = vector.load %arg7[%c0_20, %c0_21] : memref<64x2xf32, #tpu.memory_space<vmem>>, vector<64x2xf32>
    %cst_22 = arith.constant dense<0.000000e+00> : vector<48x2xf32>
    %32 = tpu.matmul %21, %31, %cst_22 {dimension_numbers = #tpu.dot_dimension_numbers<[1], [0], [0], [1], [0, 0, 1, 1], [], []>} : vector<48x64xf32>, vector<64x2xf32>, vector<48x2xf32> -> vector<48x2xf32>
    %c0_23 = arith.constant 0 : index
    %c0_24 = arith.constant 0 : index
    %33 = vector.load %arg8[%c0_23, %c0_24] : memref<1x2xf32, #tpu.memory_space<vmem>>, vector<1x2xf32>
    %34 = vector.broadcast %33 : vector<1x2xf32> to vector<48x2xf32>
    %35 = arith.addf %32, %34 : vector<48x2xf32>
    %c0_25 = arith.constant 0 : index
    %c0_26 = arith.constant 0 : index
    %36 = vector.load %arg9[%c0_25, %c0_26] : memref<32x32xf32, #tpu.memory_space<vmem>>, vector<32x32xf32>
    %cst_27 = arith.constant dense<0.000000e+00> : vector<48x32xf32>
    %37 = tpu.matmul %30, %36, %cst_27 {dimension_numbers = #tpu.dot_dimension_numbers<[1], [0], [0], [1], [0, 0, 1, 1], [], []>} : vector<48x32xf32>, vector<32x32xf32>, vector<48x32xf32> -> vector<48x32xf32>
    %c0_28 = arith.constant 0 : index
    %c0_29 = arith.constant 0 : index
    %38 = vector.load %arg10[%c0_28, %c0_29] : memref<1x32xf32, #tpu.memory_space<vmem>>, vector<1x32xf32>
    %39 = vector.broadcast %38 : vector<1x32xf32> to vector<48x32xf32>
    %40 = arith.addf %37, %39 : vector<48x32xf32>
    %cst_30 = arith.constant 5.000000e-01 : f32
    %41 = vector.broadcast %cst_30 : f32 to vector<48x32xf32>
    %42 = arith.mulf %41, %40 : vector<48x32xf32>
    %cst_31 = arith.constant 0.707106769 : f32
    %43 = vector.broadcast %cst_31 : f32 to vector<48x32xf32>
    %44 = arith.mulf %40, %43 : vector<48x32xf32>
    %45 = math.erf %44 : vector<48x32xf32>
    %cst_32 = arith.constant 1.000000e+00 : f32
    %46 = vector.broadcast %cst_32 : f32 to vector<48x32xf32>
    %47 = arith.addf %46, %45 : vector<48x32xf32>
    %48 = arith.mulf %42, %47 : vector<48x32xf32>
    %c0_33 = arith.constant 0 : index
    %c0_34 = arith.constant 0 : index
    %49 = vector.load %arg11[%c0_33, %c0_34] : memref<32x32xf32, #tpu.memory_space<vmem>>, vector<32x32xf32>
    %cst_35 = arith.constant dense<0.000000e+00> : vector<48x32xf32>
    %50 = tpu.matmul %48, %49, %cst_35 {dimension_numbers = #tpu.dot_dimension_numbers<[1], [0], [0], [1], [0, 0, 1, 1], [], []>} : vector<48x32xf32>, vector<32x32xf32>, vector<48x32xf32> -> vector<48x32xf32>
    %c0_36 = arith.constant 0 : index
    %c0_37 = arith.constant 0 : index
    %51 = vector.load %arg12[%c0_36, %c0_37] : memref<1x32xf32, #tpu.memory_space<vmem>>, vector<1x32xf32>
    %52 = vector.broadcast %51 : vector<1x32xf32> to vector<48x32xf32>
    %53 = arith.addf %50, %52 : vector<48x32xf32>
    %cst_38 = arith.constant 5.000000e-01 : f32
    %54 = vector.broadcast %cst_38 : f32 to vector<48x16xf32>
    %55 = arith.cmpf ogt, %3, %54 : vector<48x16xf32>
    %56 = vector.extract_strided_slice %35 {offsets = [0, 0], sizes = [48, 1], strides = [1, 1]} : vector<48x2xf32> to vector<48x1xf32>
    %cst_39 = arith.constant -3.40282347E+38 : f32
    %57 = vector.shape_cast %56 : vector<48x1xf32> to vector<48x1xf32>
    %58 = vector.broadcast %57 : vector<48x1xf32> to vector<48x16xf32>
    %59 = vector.broadcast %cst_39 : f32 to vector<48x16xf32>
    %60 = arith.select %55, %58, %59 : vector<48x16xi1>, vector<48x16xf32>
    %cst_40 = arith.constant dense<0xFF800000> : vector<16xf32>
    %61 = vector.multi_reduction <maximumf>, %60, %cst_40 [0] : vector<48x16xf32> to vector<16xf32>
    %62 = vector.shape_cast %61 : vector<16xf32> to vector<1x16xf32>
    %cst_41 = arith.constant -3.000000e+38 : f32
    %63 = vector.broadcast %cst_41 : f32 to vector<1x16xf32>
    %64 = arith.cmpf ole, %62, %63 : vector<1x16xf32>
    %cst_42 = arith.constant 0.000000e+00 : f32
    %65 = vector.broadcast %cst_42 : f32 to vector<1x16xf32>
    %66 = arith.select %64, %65, %62 : vector<1x16xi1>, vector<1x16xf32>
    %cst_43 = arith.constant 0.000000e+00 : f32
    %67 = vector.shape_cast %66 : vector<1x16xf32> to vector<1x16xf32>
    %68 = vector.broadcast %67 : vector<1x16xf32> to vector<48x16xf32>
    %69 = vector.broadcast %cst_43 : f32 to vector<48x16xf32>
    %70 = arith.select %55, %68, %69 : vector<48x16xi1>, vector<48x16xf32>
    %cst_44 = arith.constant dense<0.000000e+00> : vector<48xf32>
    %71 = vector.multi_reduction <add>, %70, %cst_44 [1] : vector<48x16xf32> to vector<48xf32>
    %72 = vector.shape_cast %71 : vector<48xf32> to vector<48x1xf32>
    %73 = vector.extract_strided_slice %35 {offsets = [0, 1], sizes = [48, 1], strides = [1, 1]} : vector<48x2xf32> to vector<48x1xf32>
    %cst_45 = arith.constant -3.40282347E+38 : f32
    %74 = vector.shape_cast %73 : vector<48x1xf32> to vector<48x1xf32>
    %75 = vector.broadcast %74 : vector<48x1xf32> to vector<48x16xf32>
    %76 = vector.broadcast %cst_45 : f32 to vector<48x16xf32>
    %77 = arith.select %55, %75, %76 : vector<48x16xi1>, vector<48x16xf32>
    %cst_46 = arith.constant dense<0xFF800000> : vector<16xf32>
    %78 = vector.multi_reduction <maximumf>, %77, %cst_46 [0] : vector<48x16xf32> to vector<16xf32>
    %79 = vector.shape_cast %78 : vector<16xf32> to vector<1x16xf32>
    %cst_47 = arith.constant -3.000000e+38 : f32
    %80 = vector.broadcast %cst_47 : f32 to vector<1x16xf32>
    %81 = arith.cmpf ole, %79, %80 : vector<1x16xf32>
    %cst_48 = arith.constant 0.000000e+00 : f32
    %82 = vector.broadcast %cst_48 : f32 to vector<1x16xf32>
    %83 = arith.select %81, %82, %79 : vector<1x16xi1>, vector<1x16xf32>
    %cst_49 = arith.constant 0.000000e+00 : f32
    %84 = vector.shape_cast %83 : vector<1x16xf32> to vector<1x16xf32>
    %85 = vector.broadcast %84 : vector<1x16xf32> to vector<48x16xf32>
    %86 = vector.broadcast %cst_49 : f32 to vector<48x16xf32>
    %87 = arith.select %55, %85, %86 : vector<48x16xi1>, vector<48x16xf32>
    %cst_50 = arith.constant dense<0.000000e+00> : vector<48xf32>
    %88 = vector.multi_reduction <add>, %87, %cst_50 [1] : vector<48x16xf32> to vector<48xf32>
    %89 = vector.shape_cast %88 : vector<48xf32> to vector<48x1xf32>
    %90 = tpu.concatenate %72, %89 in 1 : vector<48x1xf32>, vector<48x1xf32> -> vector<48x2xf32>
    %91 = arith.subf %35, %90 : vector<48x2xf32>
    %92 = math.exp %91 : vector<48x2xf32>
    %93 = vector.extract_strided_slice %92 {offsets = [0, 0], sizes = [48, 1], strides = [1, 1]} : vector<48x2xf32> to vector<48x1xf32>
    %cst_51 = arith.constant 9.99999996E-13 : f32
    %94 = vector.broadcast %cst_51 : f32 to vector<48x1xf32>
    %95 = arith.addf %93, %94 : vector<48x1xf32>
    %cst_52 = arith.constant 0.000000e+00 : f32
    %96 = vector.shape_cast %95 : vector<48x1xf32> to vector<48x1xf32>
    %97 = vector.broadcast %96 : vector<48x1xf32> to vector<48x16xf32>
    %98 = vector.broadcast %cst_52 : f32 to vector<48x16xf32>
    %99 = arith.select %55, %97, %98 : vector<48x16xi1>, vector<48x16xf32>
    %cst_53 = arith.constant dense<0.000000e+00> : vector<16xf32>
    %100 = vector.multi_reduction <add>, %99, %cst_53 [0] : vector<48x16xf32> to vector<16xf32>
    %101 = vector.shape_cast %100 : vector<16xf32> to vector<1x16xf32>
    %cst_54 = arith.constant 0.000000e+00 : f32
    %102 = vector.shape_cast %101 : vector<1x16xf32> to vector<1x16xf32>
    %103 = vector.broadcast %102 : vector<1x16xf32> to vector<48x16xf32>
    %104 = vector.broadcast %cst_54 : f32 to vector<48x16xf32>
    %105 = arith.select %55, %103, %104 : vector<48x16xi1>, vector<48x16xf32>
    %cst_55 = arith.constant dense<0.000000e+00> : vector<48xf32>
    %106 = vector.multi_reduction <add>, %105, %cst_55 [1] : vector<48x16xf32> to vector<48xf32>
    %107 = vector.shape_cast %106 : vector<48xf32> to vector<48x1xf32>
    %108 = vector.extract_strided_slice %92 {offsets = [0, 1], sizes = [48, 1], strides = [1, 1]} : vector<48x2xf32> to vector<48x1xf32>
    %cst_56 = arith.constant 9.99999996E-13 : f32
    %109 = vector.broadcast %cst_56 : f32 to vector<48x1xf32>
    %110 = arith.addf %108, %109 : vector<48x1xf32>
    %cst_57 = arith.constant 0.000000e+00 : f32
    %111 = vector.shape_cast %110 : vector<48x1xf32> to vector<48x1xf32>
    %112 = vector.broadcast %111 : vector<48x1xf32> to vector<48x16xf32>
    %113 = vector.broadcast %cst_57 : f32 to vector<48x16xf32>
    %114 = arith.select %55, %112, %113 : vector<48x16xi1>, vector<48x16xf32>
    %cst_58 = arith.constant dense<0.000000e+00> : vector<16xf32>
    %115 = vector.multi_reduction <add>, %114, %cst_58 [0] : vector<48x16xf32> to vector<16xf32>
    %116 = vector.shape_cast %115 : vector<16xf32> to vector<1x16xf32>
    %cst_59 = arith.constant 0.000000e+00 : f32
    %117 = vector.shape_cast %116 : vector<1x16xf32> to vector<1x16xf32>
    %118 = vector.broadcast %117 : vector<1x16xf32> to vector<48x16xf32>
    %119 = vector.broadcast %cst_59 : f32 to vector<48x16xf32>
    %120 = arith.select %55, %118, %119 : vector<48x16xi1>, vector<48x16xf32>
    %cst_60 = arith.constant dense<0.000000e+00> : vector<48xf32>
    %121 = vector.multi_reduction <add>, %120, %cst_60 [1] : vector<48x16xf32> to vector<48xf32>
    %122 = vector.shape_cast %121 : vector<48xf32> to vector<48x1xf32>
    %123 = tpu.concatenate %107, %122 in 1 : vector<48x1xf32>, vector<48x1xf32> -> vector<48x2xf32>
    %124 = tpu.reciprocal %123 : vector<48x2xf32> -> vector<48x2xf32>
    %125 = arith.mulf %92, %124 : vector<48x2xf32>
    %126 = vector.extract_strided_slice %125 {offsets = [0, 0], sizes = [16, 2], strides = [1, 1]} : vector<48x2xf32> to vector<16x2xf32>
    %cst_61 = arith.constant dense<0.000000e+00> : vector<48x2xf32>
    %127 = tpu.matmul %3, %126, %cst_61 {dimension_numbers = #tpu.dot_dimension_numbers<[1], [0], [0], [1], [0, 0, 1, 1], [], []>} : vector<48x16xf32>, vector<16x2xf32>, vector<48x2xf32> -> vector<48x2xf32>
    %cst_62 = arith.constant dense<0.000000e+00> : vector<48xf32>
    %128 = vector.multi_reduction <add>, %127, %cst_62 [1] : vector<48x2xf32> to vector<48xf32>
    %129 = vector.shape_cast %128 : vector<48xf32> to vector<48x1xf32>
    %cst_63 = arith.constant 5.000000e-01 : f32
    %130 = vector.broadcast %cst_63 : f32 to vector<48x1xf32>
    %131 = arith.mulf %129, %130 : vector<48x1xf32>
    %132 = vector.broadcast %131 : vector<48x1xf32> to vector<48x32xf32>
    %133 = arith.mulf %132, %53 : vector<48x32xf32>
    %134 = tpu.transpose %3, [1, 0] : vector<48x16xf32> -> vector<16x48xf32>
    %cst_64 = arith.constant dense<0.000000e+00> : vector<16x32xf32>
    %135 = tpu.matmul %134, %133, %cst_64 {dimension_numbers = #tpu.dot_dimension_numbers<[1], [0], [0], [1], [0, 0, 1, 1], [], []>} : vector<16x48xf32>, vector<48x32xf32>, vector<16x32xf32> -> vector<16x32xf32>
    %c0_65 = arith.constant 0 : index
    %c0_66 = arith.constant 0 : index
    %136 = vector.load %arg17[%c0_65, %c0_66] : memref<1x32xf32, #tpu.memory_space<vmem>>, vector<1x32xf32>
    %c0_67 = arith.constant 0 : index
    %c0_68 = arith.constant 0 : index
    %137 = vector.load %arg18[%c0_67, %c0_68] : memref<1x32xf32, #tpu.memory_space<vmem>>, vector<1x32xf32>
    %138 = arith.addf %7, %135 : vector<16x32xf32>
    %cst_69 = arith.constant dense<0.000000e+00> : vector<16xf32>
    %139 = vector.multi_reduction <add>, %138, %cst_69 [1] : vector<16x32xf32> to vector<16xf32>
    %140 = vector.shape_cast %139 : vector<16xf32> to vector<16x1xf32>
    %cst_70 = arith.constant 3.200000e+01 : f32
    %141 = vector.broadcast %cst_70 : f32 to vector<16x1xf32>
    %142 = arith.divf %140, %141 : vector<16x1xf32>
    %143 = vector.broadcast %142 : vector<16x1xf32> to vector<16x32xf32>
    %144 = arith.subf %138, %143 : vector<16x32xf32>
    %145 = arith.mulf %144, %144 : vector<16x32xf32>
    %cst_71 = arith.constant dense<0.000000e+00> : vector<16xf32>
    %146 = vector.multi_reduction <add>, %145, %cst_71 [1] : vector<16x32xf32> to vector<16xf32>
    %147 = vector.shape_cast %146 : vector<16xf32> to vector<16x1xf32>
    %cst_72 = arith.constant 3.200000e+01 : f32
    %148 = vector.broadcast %cst_72 : f32 to vector<16x1xf32>
    %149 = arith.divf %147, %148 : vector<16x1xf32>
    %150 = vector.broadcast %142 : vector<16x1xf32> to vector<16x32xf32>
    %151 = arith.subf %138, %150 : vector<16x32xf32>
    %cst_73 = arith.constant 9.99999974E-6 : f32
    %152 = vector.broadcast %cst_73 : f32 to vector<16x1xf32>
    %153 = arith.addf %149, %152 : vector<16x1xf32>
    %154 = math.rsqrt %153 : vector<16x1xf32>
    %155 = vector.broadcast %154 : vector<16x1xf32> to vector<16x32xf32>
    %156 = arith.mulf %151, %155 : vector<16x32xf32>
    %157 = vector.broadcast %136 : vector<1x32xf32> to vector<16x32xf32>
    %158 = arith.mulf %156, %157 : vector<16x32xf32>
    %159 = vector.broadcast %137 : vector<1x32xf32> to vector<16x32xf32>
    %160 = arith.addf %158, %159 : vector<16x32xf32>
    %c0_74 = arith.constant 0 : index
    %c0_75 = arith.constant 0 : index
    %161 = vector.load %arg13[%c0_74, %c0_75] : memref<32x128xf32, #tpu.memory_space<vmem>>, vector<32x128xf32>
    %cst_76 = arith.constant dense<0.000000e+00> : vector<16x128xf32>
    %162 = tpu.matmul %160, %161, %cst_76 {dimension_numbers = #tpu.dot_dimension_numbers<[1], [0], [0], [1], [0, 0, 1, 1], [], []>} : vector<16x32xf32>, vector<32x128xf32>, vector<16x128xf32> -> vector<16x128xf32>
    %c0_77 = arith.constant 0 : index
    %c0_78 = arith.constant 0 : index
    %163 = vector.load %arg14[%c0_77, %c0_78] : memref<1x128xf32, #tpu.memory_space<vmem>>, vector<1x128xf32>
    %164 = vector.broadcast %163 : vector<1x128xf32> to vector<16x128xf32>
    %165 = arith.addf %162, %164 : vector<16x128xf32>
    %cst_79 = arith.constant 5.000000e-01 : f32
    %166 = vector.broadcast %cst_79 : f32 to vector<16x128xf32>
    %167 = arith.mulf %166, %165 : vector<16x128xf32>
    %cst_80 = arith.constant 0.707106769 : f32
    %168 = vector.broadcast %cst_80 : f32 to vector<16x128xf32>
    %169 = arith.mulf %165, %168 : vector<16x128xf32>
    %170 = math.erf %169 : vector<16x128xf32>
    %cst_81 = arith.constant 1.000000e+00 : f32
    %171 = vector.broadcast %cst_81 : f32 to vector<16x128xf32>
    %172 = arith.addf %171, %170 : vector<16x128xf32>
    %173 = arith.mulf %167, %172 : vector<16x128xf32>
    %c0_82 = arith.constant 0 : index
    %c0_83 = arith.constant 0 : index
    %174 = vector.load %arg15[%c0_82, %c0_83] : memref<128x32xf32, #tpu.memory_space<vmem>>, vector<128x32xf32>
    %cst_84 = arith.constant dense<0.000000e+00> : vector<16x32xf32>
    %175 = tpu.matmul %173, %174, %cst_84 {dimension_numbers = #tpu.dot_dimension_numbers<[1], [0], [0], [1], [0, 0, 1, 1], [], []>} : vector<16x128xf32>, vector<128x32xf32>, vector<16x32xf32> -> vector<16x32xf32>
    %c0_85 = arith.constant 0 : index
    %c0_86 = arith.constant 0 : index
    %176 = vector.load %arg16[%c0_85, %c0_86] : memref<1x32xf32, #tpu.memory_space<vmem>>, vector<1x32xf32>
    %177 = vector.broadcast %176 : vector<1x32xf32> to vector<16x32xf32>
    %178 = arith.addf %175, %177 : vector<16x32xf32>
    %179 = arith.addf %178, %135 : vector<16x32xf32>
    %cst_87 = arith.constant dense<0.000000e+00> : vector<16xf32>
    %180 = vector.multi_reduction <add>, %179, %cst_87 [1] : vector<16x32xf32> to vector<16xf32>
    %181 = vector.shape_cast %180 : vector<16xf32> to vector<16x1xf32>
    %cst_88 = arith.constant 3.200000e+01 : f32
    %182 = vector.broadcast %cst_88 : f32 to vector<16x1xf32>
    %183 = arith.divf %181, %182 : vector<16x1xf32>
    %184 = vector.broadcast %183 : vector<16x1xf32> to vector<16x32xf32>
    %185 = arith.subf %179, %184 : vector<16x32xf32>
    %186 = arith.mulf %185, %185 : vector<16x32xf32>
    %cst_89 = arith.constant dense<0.000000e+00> : vector<16xf32>
    %187 = vector.multi_reduction <add>, %186, %cst_89 [1] : vector<16x32xf32> to vector<16xf32>
    %188 = vector.shape_cast %187 : vector<16xf32> to vector<16x1xf32>
    %cst_90 = arith.constant 3.200000e+01 : f32
    %189 = vector.broadcast %cst_90 : f32 to vector<16x1xf32>
    %190 = arith.divf %188, %189 : vector<16x1xf32>
    %191 = vector.broadcast %183 : vector<16x1xf32> to vector<16x32xf32>
    %192 = arith.subf %179, %191 : vector<16x32xf32>
    %cst_91 = arith.constant 9.99999974E-6 : f32
    %193 = vector.broadcast %cst_91 : f32 to vector<16x1xf32>
    %194 = arith.addf %190, %193 : vector<16x1xf32>
    %195 = math.rsqrt %194 : vector<16x1xf32>
    %196 = vector.broadcast %195 : vector<16x1xf32> to vector<16x32xf32>
    %197 = arith.mulf %192, %196 : vector<16x32xf32>
    %198 = vector.broadcast %136 : vector<1x32xf32> to vector<16x32xf32>
    %199 = arith.mulf %197, %198 : vector<16x32xf32>
    %200 = vector.broadcast %137 : vector<1x32xf32> to vector<16x32xf32>
    %201 = arith.addf %199, %200 : vector<16x32xf32>
    %c0_92 = arith.constant 0 : index
    %c0_93 = arith.constant 0 : index
    %202 = vector.load %arg21[%c0_92, %c0_93] : memref<16x32xf32, #tpu.memory_space<vmem>>, vector<16x32xf32>
    tpu.vector_store %arg21[%c0_92, %c0_93], %201 {strides = array<i32>} : memref<16x32xf32, #tpu.memory_space<vmem>>, vector<16x32xf32>,
    %c0_94 = arith.constant 0 : index
    %c0_95 = arith.constant 0 : index
    %203 = vector.load %arg19[%c0_94, %c0_95] : memref<32x32xf32, #tpu.memory_space<vmem>>, vector<32x32xf32>
    %cst_96 = arith.constant dense<0.000000e+00> : vector<16x32xf32>
    %204 = tpu.matmul %201, %203, %cst_96 {dimension_numbers = #tpu.dot_dimension_numbers<[1], [0], [0], [1], [0, 0, 1, 1], [], []>} : vector<16x32xf32>, vector<32x32xf32>, vector<16x32xf32> -> vector<16x32xf32>
    %c0_97 = arith.constant 0 : index
    %c0_98 = arith.constant 0 : index
    %205 = vector.load %arg20[%c0_97, %c0_98] : memref<1x32xf32, #tpu.memory_space<vmem>>, vector<1x32xf32>
    %206 = vector.broadcast %205 : vector<1x32xf32> to vector<16x32xf32>
    %207 = arith.addf %204, %206 : vector<16x32xf32>
    %c0_99 = arith.constant 0 : index
    %c0_100 = arith.constant 0 : index
    %208 = vector.load %arg22[%c0_99, %c0_100] : memref<16x32xf32, #tpu.memory_space<vmem>>, vector<16x32xf32>
    tpu.vector_store %arg22[%c0_99, %c0_100], %207 {strides = array<i32>} : memref<16x32xf32, #tpu.memory_space<vmem>>, vector<16x32xf32>,
    return
  }
}

</mosaic_0001>

<bundles_post_ra>
// kernel: tpu_custom_call.1
= control target key start
LH: loop header
LB: loop body
LE: loop exit
PB: predicated region body
PF: predicated region fallthrough
CT: control target
= control target key end

     0   :  { %s3250_s0 = inlined_call_operand.vmem [shape: bf16[48,16], index: 0, kind: input, shape index: {}]   ;;  %s3251_s1 = inlined_call_operand.vmem [shape: bf16[48,16], index: 1, kind: input, shape index: {}]   ;;  %s3252_s2 = inlined_call_operand.vmem [shape: f32[16,160], index: 2, kind: input, shape index: {}]   ;;  %s3253_s3 = inlined_call_operand.vmem [shape: f32[16,64], index: 3, kind: input, shape index: {}]   ;;  %s3254_s4 = inlined_call_operand.vmem [shape: f32[48,32], index: 4, kind: input, shape index: {}]   ;;  %s3255_s5 = inlined_call_operand.vmem [shape: f32[256,96], index: 5, kind: input, shape index: {}]   ;;  %s3256_s6 = inlined_call_operand.vmem [shape: f32[1,96], index: 6, kind: input, shape index: {}]   ;;  %s3257_s7 = inlined_call_operand.vmem [shape: f32[64,2], index: 7, kind: input, shape index: {}]   ;;  %s3258_s8 = inlined_call_operand.vmem [shape: f32[1,2], index: 8, kind: input, shape index: {}]   ;;  %s3259_s9 = inlined_call_operand.vmem [shape: f32[32,32], index: 9, kind: input, shape index: {}]   ;;  %s3260_s10 = inlined_call_operand.vmem [shape: f32[1,32], index: 10, kind: input, shape index: {}]   ;;  %s3261_s11 = inlined_call_operand.vmem [shape: f32[32,32], index: 11, kind: input, shape index: {}]   ;;  %s3262_s12 = inlined_call_operand.vmem [shape: f32[1,32], index: 12, kind: input, shape index: {}]   ;;  %s3263_s13 = inlined_call_operand.vmem [shape: f32[32,128], index: 13, kind: input, shape index: {}]   ;;  %s3264_s14 = inlined_call_operand.vmem [shape: f32[1,128], index: 14, kind: input, shape index: {}]   ;;  %s3265_s15 = inlined_call_operand.vmem [shape: f32[128,32], index: 15, kind: input, shape index: {}]   ;;  %s3266_s16 = inlined_call_operand.vmem [shape: f32[1,32], index: 16, kind: input, shape index: {}]   ;;  %s3267_s17 = inlined_call_operand.vmem [shape: f32[1,32], index: 17, kind: input, shape index: {}]   ;;  %s3268_s18 = inlined_call_operand.vmem [shape: f32[1,32], index: 18, kind: input, shape index: {}]   ;;  %s3269_s19 = inlined_call_operand.vmem [shape: f32[32,32], index: 19, kind: input, shape index: {}]   ;;  %s3270_s20 = inlined_call_operand.vmem [shape: f32[1,32], index: 20, kind: input, shape index: {}]   ;;  %s3271_s21 = inlined_call_operand.hbm [shape: f32[16,32], index: 21, kind: output, shape index: {0}]   ;;  %s3272_s22 = inlined_call_operand.hbm [shape: f32[16,32], index: 22, kind: output, shape index: {1}]  }
   0x1   :  { %3279 = sst [smem:[#allocation8_spill]] %s3250_s0 }
   0x2   :  { %3280 = sst [smem:[#allocation9_spill]] %s3251_s1 }
   0x3   :  { %3281 = sst [smem:[#allocation10_spill]] %s3252_s2 }
   0x4   :  { %3282 = sst [smem:[#allocation11_spill]] %s3253_s3 }
   0x5   :  { %3283 = sst [smem:[#allocation12_spill]] %s3254_s4 }
   0x6   :  { %3284 = sst [smem:[#allocation13_spill]] %s3255_s5 }
   0x7   :  { %3285 = sst [smem:[#allocation14_spill]] %s3256_s6 }
   0x8   :  { %28 = vsyncpa [#allocation3], 0  ;;  %s3286_s29 = sld [smem:[#allocation11_spill]]  ;;  %vm108_vm0 = vcmask 130048   ;;  %v2463_v7 = vmov 0.0  }
   0x9   :  { %s3287_s1 = sld [smem:[#allocation9_spill]]  ;;  %191 = vmatprep.mubr.f32.mxu0 %v2463_v7 }
   0xa   :  { %s3288_s26 = sld [smem:[#allocation10_spill]] }
   0xb   :  { %s3289_s24 = sld [smem:[#allocation8_spill]] }
   0xe   :  { %v101_v0 = vld [vmem:[%s3286_s29 + $0x8] sm:$0xff]  ;;  %v100_v1 = vld [vmem:[%s3286_s29] sm:$0xff] }
   0xf   :  { %v2026_v2 = vld [vmem:[%s3287_s1] sm:$0xff]   ;;  %2179 = vmatprep.subr.mxu1 %v101_v0  ;;  %v2039_v5 = vld [vmem:[%s3287_s1 + $0x8] sm:$0xff]   ;;  %v2040_v11 = vld [vmem:[%s3287_s1 + $0x10] sm:$0xff]  }
  0x10   :  { %v2597_v3 = vunpack.c.l.bf16 %v2026_v2  ;;  %v2599_v4 = vunpack.c.h.bf16 %v2026_v2  ;;  %v99_v6 = vld [vmem:[%s3288_s26 + $0x18] sm:$0xff]  ;;  %2180 = vmatpush3.msra.mxu1 %v101_v0  ;;  %v2607_v8 = vunpack.c.l.bf16 %v2039_v5  ;;  %v98_v9 = vld [vmem:[%s3288_s26 + $0x10] sm:$0xff]  ;;  %v97_v10 = vld [vmem:[%s3288_s26 + $0x8] sm:$0xff] }
  0x11   :  { %155 = vmatprep.subr.mxu0 %v99_v6  ;;  %2181 = vmatprep.subr.mxu1 %v100_v1  ;;  %v96_v12 = vld [vmem:[%s3288_s26] sm:$0xff] }
  0x12   :  { %2183 = vmatprep.mubr.msk.f32.mxu1 %vm108_vm0, %v2597_v3  ;;  %v2014_v13 = vld [vmem:[%s3289_s24] sm:$0xff]   ;;  %2182 = vmatpush3.msra.mxu1 %v100_v1 }
  0x13   :  { %156 = vmatpush1.msra.mxu0 %v98_v9  ;;  %v2015_v14 = vunpack.c.l.bf16 %v2014_v13 }
  0x14   :  { %29 = vsyncpa [#allocation5], 0  ;;  %2184 = vmatmul.mubr.msk.f32.vlgmr.msra.gmra.mxu1 %vm108_vm0, %v2599_v4  ;;  %v2628_v15 = vunpack.c.h.bf16 %v2039_v5  ;;  %157 = vmatprep.subr.mxu0 %v97_v10  ;;  %v2632_v16 = vunpack.c.l.bf16 %v2040_v11  ;;  %v2016_v17 = vunpack.c.h.bf16 %v2014_v13  ;;  %v2037_v18 = vld [vmem:[%s3289_s24 + $0x8] sm:$0xff]   ;;  %v2640_v19 = vunpack.c.h.bf16 %v2040_v11  ;;  %v2038_v22 = vld [vmem:[%s3289_s24 + $0x10] sm:$0xff]   ;;  %s3290_s28 = sld [smem:[#allocation13_spill]]  ;;  %s2464_s2 = smov 32  }
  0x15   :  { %2186 = vmatprep.mubr.msk.f32.mxu1 %vm108_vm0, %v2607_v8  ;;  %158 = vmatpush1.msra.mxu0 %v96_v12  ;;  %v2019_v20 = vunpack.c.l.bf16 %v2037_v18  ;;  %v2020_v21 = vunpack.c.h.bf16 %v2037_v18  ;;  %v2023_v23 = vunpack.c.l.bf16 %v2038_v22  ;;  %v2024_v24 = vunpack.c.h.bf16 %v2038_v22  ;;  %s3291_s29 = sld [smem:[#allocation12_spill]]  ;;  %s2465_s0 = smov 96   ;;  %v592_v6 = vld [vmem:[%s3257_s7 + $0x38] sm:$0xff] }
  0x16   :  { %1962 = vmatmul.mubr.msk.f32.vlgmr.msra.gmra.mxu0 %vm108_vm0, %v2015_v14  ;;  %2192 = vmatprep.subr.mxu1 %v592_v6  ;;  %vm389_vm1 = vcmask 261120   ;;  %vm396_vm2 = vcmask 785408   ;;  %s3292_s4 = sld [smem:[#allocation14_spill]]  ;;  %vm600_vm4 = vcmask 523264   ;;  %vm1009_vm10 = vcmp.gt.f32.partialorder %v2640_v19, 0.5 }
  0x17   :  { %197 = vmatprep.mubr.f32.mxu0 %v2463_v7  ;;  %2193 = vmatpush3.msra.mxu1 %v592_v6  ;;  %vm1005_vm11 = vcmp.gt.f32.partialorder %v2599_v4, 0.5  ;;  %vm1004_vm12 = vcmp.gt.f32.partialorder %v2597_v3, 0.5  ;;  %vm1007_vm13 = vcmp.gt.f32.partialorder %v2628_v15, 0.5  ;;  %vm1006_vm14 = vcmp.gt.f32.partialorder %v2607_v8, 0.5 }
  0x18   :  { %2187 = vmatmul.mubr.msk.f32.gmra.mxu1 %vm108_vm0, %v2628_v15  ;;  %vm1008_vm15 = vcmp.gt.f32.partialorder %v2632_v16, 0.5 }
  0x19   :  { %2189 = vmatprep.mubr.msk.f32.mxu1 %vm108_vm0, %v2632_v16 }
  0x1a   :  { %1963 = vmatmul.mubr.msk.f32.gmra.mxu0 %vm108_vm0, %v2016_v17  ;;  %v434_v25 = vld [vmem:[%s3290_s28 + $0xf8] sm:$0xff]  ;;  %v433_v27 = vld [vmem:[%s3290_s28 + $0xf0] sm:$0xff]  ;;  %v432_v29 = vld [vmem:[%s3290_s28 + $0xe8] sm:$0xff] }
  0x1b   :  { %203 = vmatprep.mubr.f32.mxu0 %v2463_v7  ;;  %v418_v26 = vld [vmem:[%s3290_s28 + $0x78] sm:$0xff]  ;;  %2049 = vmatprep.subr.mxu0 %v434_v25  ;;  %v417_v28 = vld [vmem:[%s3290_s28 + $0x70] sm:$0xff]  ;;  %v416_v30 = vld [vmem:[%s3290_s28 + $0x68] sm:$0xff] }
  0x1c   :  { %2190 = vmatmul.mubr.msk.f32.gmra.mxu1 %vm108_vm0, %v2640_v19  ;;  %2050 = vmatpush3.msra.mxu0 %v418_v26  ;;  %v431_v31 = vld [vmem:[%s3290_s28 + $0xe0] sm:$0xff]  ;;  %v430_v33 = vld [vmem:[%s3290_s28 + $0xd8] sm:$0xff]  ;;  %v429_v35 = vld [vmem:[%s3290_s28 + $0xd0] sm:$0xff] }
  0x1d   :  { %2051 = vmatprep.subr.mxu0 %v433_v27  ;;  %v415_v32 = vld [vmem:[%s3290_s28 + $0x60] sm:$0xff]  ;;  %v414_v34 = vld [vmem:[%s3290_s28 + $0x58] sm:$0xff]  ;;  %v413_v36 = vld [vmem:[%s3290_s28 + $0x50] sm:$0xff] }
  0x1e   :  { %1964 = vmatmul.mubr.msk.f32.gmra.mxu0 %vm108_vm0, %v2019_v20  ;;  %v428_v37 = vld [vmem:[%s3290_s28 + $0xc8] sm:$0xff]  ;;  %v427_v39 = vld [vmem:[%s3290_s28 + $0xc0] sm:$0xff]  ;;  %v426_v41 = vld [vmem:[%s3290_s28 + $0xb8] sm:$0xff] }
  0x1f   :  { %209 = vmatprep.mubr.f32.mxu0 %v2463_v7  ;;  %2052 = vmatpush3.msra.mxu0 %v417_v28  ;;  %v412_v38 = vld [vmem:[%s3290_s28 + $0x48] sm:$0xff]  ;;  %v411_v40 = vld [vmem:[%s3290_s28 + $0x40] sm:$0xff]  ;;  %v410_v42 = vld [vmem:[%s3290_s28 + $0x38] sm:$0xff] }
  0x20   :  { %2053 = vmatprep.subr.mxu0 %v432_v29  ;;  %v425_v43 = vld [vmem:[%s3290_s28 + $0xb0] sm:$0xff]  ;;  %v424_v45 = vld [vmem:[%s3290_s28 + $0xa8] sm:$0xff]  ;;  %v423_v47 = vld [vmem:[%s3290_s28 + $0xa0] sm:$0xff] }
  0x21   :  { %2054 = vmatpush3.msra.mxu0 %v416_v30  ;;  %v409_v44 = vld [vmem:[%s3290_s28 + $0x30] sm:$0xff]  ;;  %v408_v46 = vld [vmem:[%s3290_s28 + $0x28] sm:$0xff]  ;;  %v407_v48 = vld [vmem:[%s3290_s28 + $0x20] sm:$0xff] }
  0x22   :  { %1965 = vmatmul.mubr.msk.f32.gmra.mxu0 %vm108_vm0, %v2020_v21  ;;  %2055 = vmatprep.subr.mxu0 %v431_v31  ;;  %v422_v49 = vld [vmem:[%s3290_s28 + $0x98] sm:$0xff]  ;;  %v421_v51 = vld [vmem:[%s3290_s28 + $0x90] sm:$0xff]  ;;  %v420_v53 = vld [vmem:[%s3290_s28 + $0x88] sm:$0xff] }
  0x23   :  { %215 = vmatprep.mubr.f32.mxu0 %v2463_v7  ;;  %2056 = vmatpush3.msra.mxu0 %v415_v32  ;;  %v406_v50 = vld [vmem:[%s3290_s28 + $0x18] sm:$0xff]  ;;  %v405_v52 = vld [vmem:[%s3290_s28 + $0x10] sm:$0xff]  ;;  %v404_v54 = vld [vmem:[%s3290_s28 + $0x8] sm:$0xff] }
  0x24   :  { %2057 = vmatprep.subr.mxu0 %v430_v33  ;;  %v419_v55 = vld [vmem:[%s3290_s28 + $0x80] sm:$0xff]  ;;  %v103_v59 = vld [vmem:[%s3291_s29 + $0x8] sm:$0xff]  ;;  %v104_v62 = vld [vmem:[%s3291_s29 + $0x10] sm:$0xff] }
  0x25   :  { %2058 = vmatpush3.msra.mxu0 %v414_v34  ;;  %v403_v56 = vld [vmem:[%s3290_s28] sm:$0xff]  ;;  %v105_v0 = vld [vmem:[%s3291_s29 + $0x18] sm:$0xff] }
  0x26   :  { %1966 = vmatmul.mubr.msk.f32.gmra.mxu0 %vm108_vm0, %v2023_v23  ;;  %2059 = vmatprep.subr.mxu0 %v429_v35  ;;  %v102_v60 = vld [vmem:[%s3291_s29] sm:$0xff] }
  0x27   :  { %221 = vmatprep.mubr.f32.mxu0 %v2463_v7  ;;  %2060 = vmatpush3.msra.mxu0 %v413_v36  ;;  %v106_v2 = vld [vmem:[%s3291_s29 + $0x20] sm:$0xff]  ;;  %v107_v7 = vld [vmem:[%s3291_s29 + $0x28] sm:$0xff] }
  0x28   :  { %2061 = vmatprep.subr.mxu0 %v428_v37 }
  0x29   :  { %2062 = vmatpush3.msra.mxu0 %v412_v38 }
  0x2a   :  { %1967 = vmatmul.mubr.msk.f32.gmra.mxu0 %vm108_vm0, %v2024_v24  ;;  %2063 = vmatprep.subr.mxu0 %v427_v39 }
  0x2b   :  { %2064 = vmatpush3.msra.mxu0 %v411_v40 }
  0x2c   :  { %2065 = vmatprep.subr.mxu0 %v426_v41 }
  0x2d   :  { %2066 = vmatpush3.msra.mxu0 %v410_v42 }
  0x2e   :  { %2067 = vmatprep.subr.mxu0 %v425_v43 }
  0x2f   :  { %2068 = vmatpush3.msra.mxu0 %v409_v44 }
  0x30   :  { %2069 = vmatprep.subr.mxu0 %v424_v45 }
  0x31   :  { %2070 = vmatpush3.msra.mxu0 %v408_v46 }
  0x32   :  { %2071 = vmatprep.subr.mxu0 %v423_v47 }
  0x33   :  { %2072 = vmatpush3.msra.mxu0 %v407_v48  ;;  %v591_v48 = vld [vmem:[%s3257_s7 + $0x30] sm:$0xff] }
  0x34   :  { %2073 = vmatprep.subr.mxu0 %v422_v49  ;;  %2194 = vmatprep.subr.mxu1 %v591_v48  ;;  %v590_v49 = vld [vmem:[%s3257_s7 + $0x28] sm:$0xff] }
  0x35   :  { %2074 = vmatpush3.msra.mxu0 %v406_v50  ;;  %2195 = vmatpush3.msra.mxu1 %v591_v48  ;;  %v589_v50 = vld [vmem:[%s3257_s7 + $0x20] sm:$0xff] }
  0x36   :  { %2075 = vmatprep.subr.mxu0 %v421_v51  ;;  %2196 = vmatprep.subr.mxu1 %v590_v49  ;;  %v588_v51 = vld [vmem:[%s3257_s7 + $0x18] sm:$0xff] }
  0x37   :  { %2076 = vmatpush3.msra.mxu0 %v405_v52  ;;  %2197 = vmatpush3.msra.mxu1 %v590_v49  ;;  %v587_v52 = vld [vmem:[%s3257_s7 + $0x10] sm:$0xff] }
  0x38   :  { %2077 = vmatprep.subr.mxu0 %v420_v53  ;;  %2198 = vmatprep.subr.mxu1 %v589_v50  ;;  %v586_v53 = vld [vmem:[%s3257_s7 + $0x8] sm:$0xff] }
  0x39   :  { %2078 = vmatpush3.msra.mxu0 %v404_v54  ;;  %2199 = vmatpush3.msra.mxu1 %v589_v50  ;;  %v585_v54 = vld [vmem:[%s3257_s7] sm:$0xff] }
  0x3a   :  { %2079 = vmatprep.subr.mxu0 %v419_v55  ;;  %2200 = vmatprep.subr.mxu1 %v588_v51 }
  0x3b   :  { %2080 = vmatpush3.msra.mxu0 %v403_v56  ;;  %2201 = vmatpush3.msra.mxu1 %v588_v51  ;;  %v1974_v56 = vld [vmem:[%s3292_s4] ss:$0 sm:$0xff] }
  0x3c   :  { %2202 = vmatprep.subr.mxu1 %v587_v52 }
  0x3d   :  { %2203 = vmatpush3.msra.mxu1 %v587_v52 }
  0x3e   :  { %2204 = vmatprep.subr.mxu1 %v586_v53 }
  0x3f   :  { %2205 = vmatpush3.msra.mxu1 %v586_v53 }
  0x40   :  { %2206 = vmatprep.subr.mxu1 %v585_v54 }
  0x41   :  { %2207 = vmatpush3.msra.mxu1 %v585_v54 }
  0xd4   :  { %v2185_v57 = vpop.f32.mrf.mxu1 }
  0xd5   :  { %349 = vrot.lane.b32.xlu1 %v2185_v57, %s2464_s2 }
  0xd6   :  { %v312_v58 = vpop.f32.mrf.mxu1  ;;  %v193_v9 = vpop.f32.mrf.mxu0 }
  0xd7   :  { %347 = vrot.lane.b32.xlu0 %v312_v58, %s2464_s2 }
  0xd8   :  { %v2188_v61 = vpop.f32.mrf.mxu1  ;;  %v195_v10 = vpop.f32.mrf.mxu0 }
  0xd9   :  { %373 = vrot.lane.b32.xlu1 %v103_v59, %s2465_s0 }
  0xda   :  { %v322_v63 = vpop.f32.mrf.mxu1  ;;  %v199_v11 = vpop.f32.mrf.mxu0 }
  0xdb   :  { %371 = vrot.lane.b32.xlu0 %v102_v60, %s2465_s0 }
  0xdc   :  { %v2191_v1 = vpop.f32.mrf.mxu1  ;;  %v201_v12 = vpop.f32.mrf.mxu0 }
  0xdd   :  { %375 = vrot.lane.b32.xlu1 %v104_v62, %s2465_s0 }
  0xde   :  { %v332_v5 = vpop.f32.mrf.mxu1  ;;  %v205_v13 = vpop.f32.mrf.mxu0 }
  0xdf   :  { %351 = vrot.lane.b32.xlu0 %v322_v63, %s2464_s2 }
  0xe0   :  { %v207_v14 = vpop.f32.mrf.mxu0 }
  0xe1   :  { %377 = vrot.lane.b32.xlu1 %v105_v0, %s2465_s0 }
  0xe2   :  { %v211_v18 = vpop.f32.mrf.mxu0 }
  0xe3   :  { %353 = vrot.lane.b32.xlu0 %v2188_v61, %s2464_s2 }
  0xe4   :  { %v213_v22 = vpop.f32.mrf.mxu0 }
  0xe5   :  { %379 = vrot.lane.b32.xlu1 %v106_v2, %s2465_s0 }
  0xe6   :  { %v217_v28 = vpop.f32.mrf.mxu0 }
  0xe7   :  { %355 = vrot.lane.b32.xlu0 %v332_v5, %s2464_s2 }
  0xe8   :  { %v219_v34 = vpop.f32.mrf.mxu0 }
  0xe9   :  { %381 = vrot.lane.b32.xlu1 %v107_v7, %s2465_s0 }
  0xea   :  { %v223_v39 = vpop.f32.mrf.mxu0 }
  0xeb   :  { %357 = vrot.lane.b32.xlu0 %v2191_v1, %s2464_s2 }
  0xec   :  { %v225_v42 = vpop.f32.mrf.mxu0 }
 0x147   :  { %v350_v17 = vpop.permute.xlu1 %349 }
 0x148   :  { %v391_v26 = vsel %vm389_vm1, %v201_v12, %v350_v17 }
 0x149   :  { %v348_v20 = vpop.permute.xlu0 %347 }
 0x14a   :  { %v390_v23 = vsel %vm389_vm1, %v195_v10, %v348_v20 }
 0x14b   :  { %v374_v21 = vpop.permute.xlu1 %373 }
 0x14c   :  { %v398_v29 = vsel %vm396_vm2, %v391_v26, %v374_v21 }
 0x14d   :  { %v372_v24 = vpop.permute.xlu0 %371 }
 0x14e   :  { %v397_v25 = vsel %vm396_vm2, %v390_v23, %v372_v24 }
 0x14f   :  { %506 = vmatprep.mubr.f32.mxu0 %v397_v25  ;;  %v376_v27 = vpop.permute.xlu1 %375 }
 0x150   :  { %507 = vmatmul.mubr.f32.vlgmr.msra.gmra.mxu0 %v193_v9 }
 0x151   :  { %v352_v30 = vpop.permute.xlu0 %351  ;;  %511 = vmatprep.mubr.f32.mxu0 %v398_v29 }
 0x152   :  { %v392_v31 = vsel %vm389_vm1, %v207_v14, %v352_v30 }
 0x153   :  { %v399_v32 = vsel %vm396_vm2, %v392_v31, %v376_v27  ;;  %v378_v33 = vpop.permute.xlu1 %377 }
 0x154   :  { %512 = vmatmul.mubr.f32.gmra.mxu0 %v199_v11 }
 0x155   :  { %v354_v35 = vpop.permute.xlu0 %353  ;;  %516 = vmatprep.mubr.f32.mxu0 %v399_v32 }
 0x156   :  { %v393_v36 = vsel %vm389_vm1, %v213_v22, %v354_v35  ;;  %v2467_v35 = vmov 0  }
 0x157   :  { %v400_v37 = vsel %vm396_vm2, %v393_v36, %v378_v33  ;;  %v380_v38 = vpop.permute.xlu1 %379  ;;  %2346 = vset.pattern.permute.xlu1 %v2467_v35  ;;  %v1975_v36 = vld [vmem:[%s3258_s8] ss:$0 sm:$0xff]  ;;  %s2468_s8 = smov 64  }
 0x158   :  { %517 = vmatmul.mubr.f32.gmra.mxu0 %v205_v13 }
 0x159   :  { %v356_v40 = vpop.permute.xlu0 %355  ;;  %521 = vmatprep.mubr.f32.mxu0 %v400_v37 }
 0x15a   :  { %v394_v41 = vsel %vm389_vm1, %v219_v34, %v356_v40  ;;  %v2466_v34 = vmov 1  }
 0x15b   :  { %v401_v43 = vsel %vm396_vm2, %v394_v41, %v380_v38  ;;  %v382_v44 = vpop.permute.xlu1 %381  ;;  %2347 = vset.pattern.permute.xlu0 %v2466_v34 }
 0x15c   :  { %522 = vmatmul.mubr.f32.gmra.mxu0 %v211_v18 }
 0x15d   :  { %v358_v45 = vpop.permute.xlu0 %357  ;;  %526 = vmatprep.mubr.f32.mxu0 %v401_v43 }
 0x15e   :  { %v395_v46 = vsel %vm389_vm1, %v225_v42, %v358_v45 }
 0x15f   :  { %v402_v47 = vsel %vm396_vm2, %v395_v46, %v382_v44 }
 0x160   :  { %527 = vmatmul.mubr.f32.gmra.mxu0 %v217_v28 }
 0x161   :  { %531 = vmatprep.mubr.f32.mxu0 %v402_v47 }
 0x164   :  { %532 = vmatmul.mubr.f32.gmra.mxu0 %v223_v39 }
 0x210   :  { %v2081_v55 = vpop.f32.mrf.mxu0 }
 0x212   :  { %v2082_v57 = vpop.f32.mrf.mxu0 }
 0x213   :  { %v2083_v58 = vadd.f32 %v2082_v57, %v2081_v55 }
 0x214   :  { %v2084_v59 = vpop.f32.mrf.mxu0 }
 0x215   :  { %v2807_v60 = vadd.f32 %v2083_v58, %v1974_v56 }
 0x216   :  { %v2085_v61 = vpop.f32.mrf.mxu0 }
 0x217   :  { %v2086_v62 = vadd.f32 %v2085_v61, %v2084_v59  ;;  %vm537_vm3 = vcmp.ge.f32.partialorder %v2807_v60, 0.0  ;;  %v543_v63 = vmul.f32 0.2, %v2807_v60  ;;  %v561_v47 = vmul.f32 0.70710677, %v2807_v60 }
 0x218   :  { %v2087_v0 = vpop.f32.mrf.mxu0 }
 0x219   :  { %v2811_v1 = vadd.f32 %v2086_v62, %v1974_v56  ;;  %v549_v2 = vsel %vm537_vm3, %v2807_v60, %v543_v63 }
 0x21a   :  { %v2088_v5 = vpop.f32.mrf.mxu0  ;;  %2208 = vmatprep.mubr.msk.f32.mxu1 %vm600_vm4, %v549_v2 }
 0x21b   :  { %v2089_v6 = vadd.f32 %v2088_v5, %v2087_v0  ;;  %vm538_vm5 = vcmp.ge.f32.partialorder %v2811_v1, 0.0  ;;  %v544_v7 = vmul.f32 0.2, %v2811_v1  ;;  %v562_v48 = vmul.f32 0.70710677, %v2811_v1  ;;  %v717_v0 = vld [vmem:[%s3259_s9 + $0x18] sm:$0xff] }
 0x21c   :  { %v2090_v9 = vpop.f32.mrf.mxu0  ;;  %2217 = vmatprep.subr.mxu1 %v717_v0 }
 0x21d   :  { %v2817_v10 = vadd.f32 %v2089_v6, %v1974_v56  ;;  %v550_v11 = vsel %vm538_vm5, %v2811_v1, %v544_v7  ;;  %v716_v6 = vld [vmem:[%s3259_s9 + $0x10] sm:$0xff]  ;;  %vm1410_vm5 = vcmask 15360  }
 0x21e   :  { %v2091_v12 = vpop.f32.mrf.mxu0  ;;  %2209 = vmatmul.mubr.msk.f32.vlgmr.msra.gmra.mxu1 %vm600_vm4, %v550_v11 }
 0x21f   :  { %v2092_v13 = vadd.f32 %v2091_v12, %v2090_v9  ;;  %vm539_vm6 = vcmp.ge.f32.partialorder %v2817_v10, 0.0  ;;  %v545_v14 = vmul.f32 0.2, %v2817_v10  ;;  %v563_v39 = vmul.f32 0.70710677, %v2817_v10  ;;  %2218 = vmatpush3.msra.mxu1 %v717_v0 }
 0x220   :  { %v2093_v17 = vpop.f32.mrf.mxu0  ;;  %v557_v58 = vmul.f32 0.5, %v2817_v10  ;;  %2219 = vmatprep.subr.mxu1 %v716_v6  ;;  %v555_v9 = vmul.f32 0.5, %v2807_v60 }
 0x221   :  { %v2823_v18 = vadd.f32 %v2092_v13, %v1974_v56  ;;  %v551_v20 = vsel %vm539_vm6, %v2817_v10, %v545_v14  ;;  %2365 = verf.f32 %v563_v39  ;;  %2220 = vmatpush3.msra.mxu1 %v716_v6  ;;  %v715_v10 = vld [vmem:[%s3259_s9 + $0x8] sm:$0xff]  ;;  %v714_v13 = vld [vmem:[%s3259_s9] sm:$0xff] }
 0x222   :  { %v2094_v21 = vpop.f32.mrf.mxu0  ;;  %2211 = vmatprep.mubr.msk.f32.mxu1 %vm600_vm4, %v551_v20  ;;  %2221 = vmatprep.subr.mxu1 %v715_v10 }
 0x223   :  { %v2095_v22 = vadd.f32 %v2094_v21, %v2093_v17  ;;  %vm540_vm7 = vcmp.ge.f32.partialorder %v2823_v18, 0.0  ;;  %v546_v23 = vmul.f32 0.2, %v2823_v18  ;;  %v564_v53 = vmul.f32 0.70710677, %v2823_v18  ;;  %2222 = vmatpush3.msra.mxu1 %v715_v10 }
 0x224   :  { %v2096_v24 = vpop.f32.mrf.mxu0  ;;  %2223 = vmatprep.subr.mxu1 %v714_v13  ;;  %v556_v17 = vmul.f32 0.5, %v2811_v1 }
 0x225   :  { %v2829_v25 = vadd.f32 %v2095_v22, %v1974_v56  ;;  %v552_v26 = vsel %vm540_vm7, %v2823_v18, %v546_v23  ;;  %2224 = vmatpush3.msra.mxu1 %v714_v13  ;;  %v558_v22 = vmul.f32 0.5, %v2823_v18 }
 0x226   :  { %v2097_v27 = vpop.f32.mrf.mxu0  ;;  %2212 = vmatmul.mubr.msk.f32.gmra.mxu1 %vm600_vm4, %v552_v26 }
 0x227   :  { %v2098_v28 = vadd.f32 %v2097_v27, %v2096_v24  ;;  %vm541_vm8 = vcmp.ge.f32.partialorder %v2829_v25, 0.0  ;;  %v547_v29 = vmul.f32 0.2, %v2829_v25  ;;  %v565_v42 = vmul.f32 0.70710677, %v2829_v25 }
 0x228   :  { %v559_v63 = vmul.f32 0.5, %v2829_v25 }
 0x229   :  { %v2835_v30 = vadd.f32 %v2098_v28, %v1974_v56  ;;  %v553_v31 = vsel %vm541_vm8, %v2829_v25, %v547_v29  ;;  %2367 = verf.f32 %v565_v42 }
 0x22a   :  { %2214 = vmatprep.mubr.msk.f32.mxu1 %vm600_vm4, %v553_v31  ;;  %2369 = verf.f32 %v561_v47 }
 0x22b   :  { %vm542_vm9 = vcmp.ge.f32.partialorder %v2835_v30, 0.0  ;;  %v548_v32 = vmul.f32 0.2, %v2835_v30  ;;  %2371 = verf.f32 %v562_v48  ;;  %v566_v57 = vmul.f32 0.70710677, %v2835_v30 }
 0x22c   :  { %2373 = verf.f32 %v564_v53  ;;  %v560_v25 = vmul.f32 0.5, %v2835_v30 }
 0x22d   :  { %v554_v33 = vsel %vm542_vm9, %v2835_v30, %v548_v32  ;;  %2375 = verf.f32 %v566_v57 }
 0x22e   :  { %2215 = vmatmul.mubr.msk.f32.gmra.mxu1 %vm600_vm4, %v554_v33  ;;  %v2366_v51 = vpop.eup %2365  ;;  %vm1162_vm4 = vcmask 7168  }
 0x22f   :  { %v575_v55 = vadd.f32 1.0, %v2366_v51 }
 0x231   :  { %v581_v59 = vmul.f32 %v575_v55, %v557_v58 }
 0x236   :  { %v2368_v56 = vpop.eup %2367 }
 0x237   :  { %v577_v61 = vadd.f32 1.0, %v2368_v56  ;;  %v2370_v62 = vpop.eup %2369 }
 0x238   :  { %v573_v5 = vadd.f32 1.0, %v2370_v62  ;;  %v2372_v7 = vpop.eup %2371 }
 0x239   :  { %v583_v2 = vmul.f32 %v577_v61, %v559_v63  ;;  %v574_v12 = vadd.f32 1.0, %v2372_v7  ;;  %v2374_v14 = vpop.eup %2373 }
 0x23a   :  { %v579_v11 = vmul.f32 %v573_v5, %v555_v9  ;;  %v576_v20 = vadd.f32 1.0, %v2374_v14  ;;  %v2376_v21 = vpop.eup %2375 }
 0x23b   :  { %v580_v60 = vmul.f32 %v574_v12, %v556_v17  ;;  %v578_v24 = vadd.f32 1.0, %v2376_v21 }
 0x23c   :  { %v582_v23 = vmul.f32 %v576_v20, %v558_v22 }
 0x23d   :  { %v584_v26 = vmul.f32 %v578_v24, %v560_v25 }
 0x2de   :  { %v2210_v37 = vpop.f32.mrf.mxu1 }
 0x2df   :  { %v2848_v38 = vadd.f32 %v2210_v37, %v1975_v36 }
 0x2e0   :  { %v685_v40 = vpop.f32.mrf.mxu1 }
 0x2e1   :  { %1094 = vperm.xlu0 %2347, %v2848_v38   ;;  %1017 = vperm.xlu1 %2346, %v2848_v38   ;;  %v2853_v41 = vadd.f32 %v1975_v36, %v685_v40 }
 0x2e5   :  { %2348 = vset.pattern.permute.xlu0 %v2467_v35  ;;  %2349 = vset.pattern.permute.xlu1 %v2466_v34 }
 0x2e6   :  { %v2213_v43 = vpop.f32.mrf.mxu1  ;;  %1090 = vperm.xlu1 %2349, %v2853_v41   ;;  %1012 = vperm.xlu0 %2348, %v2853_v41  }
 0x2e7   :  { %v2860_v45 = vadd.f32 %v2213_v43, %v1975_v36 }
 0x2e8   :  { %v695_v44 = vpop.f32.mrf.mxu1 }
 0x2e9   :  { %v2862_v46 = vadd.f32 %v1975_v36, %v695_v44 }
 0x2ea   :  { %2350 = vset.pattern.permute.xlu1 %v2467_v35 }
 0x2eb   :  { %1027 = vperm.xlu1 %2350, %v2860_v45   ;;  %1022 = vperm.xlu0 %2348, %v2862_v46  }
 0x2ee   :  { %v2216_v49 = vpop.f32.mrf.mxu1 }
 0x2ef   :  { %v2869_v50 = vadd.f32 %v2216_v49, %v1975_v36  ;;  %2351 = vset.pattern.permute.xlu1 %v2466_v34 }
 0x2f0   :  { %v705_v52 = vpop.f32.mrf.mxu1 }
 0x2f1   :  { %1110 = vperm.xlu1 %2351, %v2869_v50   ;;  %1037 = vperm.xlu0 %2348, %v2869_v50   ;;  %v2875_v54 = vadd.f32 %v1975_v36, %v705_v52 }
 0x2f5   :  { %2352 = vset.pattern.permute.xlu1 %v2467_v35  ;;  %2354 = vset.pattern.permute.xlu0 %v2466_v34 }
 0x2f6   :  { %1102 = vperm.xlu0 %2354, %v2860_v45   ;;  %1032 = vperm.xlu1 %2352, %v2875_v54  }
 0x2fa   :  { %735 = vrot.lane.b32.xlu0 %v581_v59, %s2468_s8  ;;  %2353 = vset.pattern.permute.xlu1 %v2466_v34 }
 0x2fb   :  { %1106 = vperm.xlu1 %2353, %v2875_v54   ;;  %2356 = vset.pattern.permute.xlu0 %v2467_v35 }
 0x2fe   :  { %739 = vrot.lane.b32.xlu0 %v583_v2, %s2468_s8 }
 0x2ff   :  { %1098 = vperm.xlu1 %2353, %v2862_v46  }
 0x303   :  { %731 = vrot.lane.b32.xlu1 %v579_v11, %s2468_s8 }
 0x304   :  { %2355 = vset.pattern.permute.xlu1 %v2467_v35 }
 0x307   :  { %733 = vrot.lane.b32.xlu1 %v580_v60, %s2468_s8 }
 0x30b   :  { %737 = vrot.lane.b32.xlu1 %v582_v23, %s2468_s8 }
 0x30f   :  { %741 = vrot.lane.b32.xlu1 %v584_v26, %s2468_s8 }
 0x35c   :  { %v1095_v1 = vpop.permute.xlu0 %1094  ;;  %v1018_v27 = vpop.permute.xlu1 %1017 }
 0x35d   :  { %v1041_v36 = vsel %vm1005_vm11, %v1018_v27, -3.4028235e+38  ;;  %v1114_v63 = vsel %vm1005_vm11, %v1095_v1, -3.4028235e+38 }
 0x35e   :  { %v1047_v44 = vsel %vm108_vm0, %v1041_v36, -inf  ;;  %v1120_v11 = vsel %vm108_vm0, %v1114_v63, -inf }
 0x361   :  { %v1091_v28 = vpop.permute.xlu1 %1090  ;;  %v1013_v29 = vpop.permute.xlu0 %1012 }
 0x362   :  { %v1040_v37 = vsel %vm1004_vm12, %v1013_v29, -3.4028235e+38  ;;  %v1113_v56 = vsel %vm1004_vm12, %v1091_v28, -3.4028235e+38 }
 0x363   :  { %v1046_v48 = vsel %vm108_vm0, %v1040_v37, -inf  ;;  %v1119_v2 = vsel %vm108_vm0, %v1113_v56, -inf }
 0x366   :  { %v1028_v31 = vpop.permute.xlu1 %1027  ;;  %v1023_v32 = vpop.permute.xlu0 %1022 }
 0x367   :  { %v1043_v39 = vsel %vm1007_vm13, %v1028_v31, -3.4028235e+38  ;;  %v1042_v40 = vsel %vm1006_vm14, %v1023_v32, -3.4028235e+38 }
 0x368   :  { %v1049_v49 = vsel %vm108_vm0, %v1043_v39, -inf  ;;  %v1048_v51 = vsel %vm108_vm0, %v1042_v40, -inf }
 0x369   :  { %v1055_v58 = vmax.f32 %v1048_v51, %v1049_v49 }
 0x36c   :  { %v1111_v18 = vpop.permute.xlu1 %1110  ;;  %v1038_v33 = vpop.permute.xlu0 %1037 }
 0x36d   :  { %v1045_v30 = vsel %vm1009_vm10, %v1038_v33, -3.4028235e+38  ;;  %v1118_v57 = vsel %vm1009_vm10, %v1111_v18, -3.4028235e+38 }
 0x36e   :  { %v1052_v42 = vsel %vm108_vm0, %v1045_v30, -inf  ;;  %v1125_v5 = vsel %vm108_vm0, %v1118_v57, -inf }
 0x36f   :  { %v1053_v53 = vmax.f32 %v1047_v44, %v1052_v42  ;;  %v1126_v14 = vmax.f32 %v1120_v11, %v1125_v5 }
 0x371   :  { %v1033_v43 = vpop.permute.xlu1 %1032  ;;  %v1103_v59 = vpop.permute.xlu0 %1102 }
 0x372   :  { %v1044_v47 = vsel %vm1008_vm15, %v1033_v43, -3.4028235e+38  ;;  %v1116_v9 = vsel %vm1007_vm13, %v1103_v59, -3.4028235e+38 }
 0x373   :  { %v1050_v52 = vsel %vm108_vm0, %v1044_v47, -inf  ;;  %v1122_v60 = vsel %vm108_vm0, %v1116_v9, -inf }
 0x374   :  { %v1051_v55 = vmax.f32 %v1046_v48, %v1050_v52 }
 0x375   :  { %v736_v27 = vpop.permute.xlu0 %735 }
 0x376   :  { %v1054_v61 = vmax.f32 %v1051_v55, %v1053_v53  ;;  %v1107_v62 = vpop.permute.xlu1 %1106 }
 0x377   :  { %v1117_v0 = vsel %vm1008_vm15, %v1107_v62, -3.4028235e+38 }
 0x378   :  { %v1056_v6 = vmax.f32 %v1054_v61, %v1055_v58  ;;  %v1123_v7 = vsel %vm108_vm0, %v1117_v0, -inf }
 0x379   :  { %v1124_v10 = vmax.f32 %v1119_v2, %v1123_v7  ;;  %v740_v36 = vpop.permute.xlu0 %739 }
 0x37a   :  { %v1057_v12 = vrot.slane %v1056_v6, 4  ;;  %v1099_v13 = vpop.permute.xlu1 %1098 }
 0x37b   :  { %v1115_v17 = vsel %vm1006_vm14, %v1099_v13, -3.4028235e+38  ;;  %v1127_v22 = vmax.f32 %v1124_v10, %v1126_v14  ;;  %v883_v14 = vld [vmem:[%s3261_s11 + $0x18] sm:$0xff] }
 0x37c   :  { %v1058_v20 = vmax.f32 %v1056_v6, %v1057_v12  ;;  %v1121_v21 = vsel %vm108_vm0, %v1115_v17, -inf  ;;  %2234 = vmatprep.subr.mxu1 %v883_v14  ;;  %v882_v17 = vld [vmem:[%s3261_s11 + $0x10] sm:$0xff] }
 0x37d   :  { %v1128_v23 = vmax.f32 %v1121_v21, %v1122_v60  ;;  %v881_v60 = vld [vmem:[%s3261_s11 + $0x8] sm:$0xff] }
 0x37e   :  { %v1059_v24 = vrot.slane %v1058_v20, 2  ;;  %v732_v25 = vpop.permute.xlu1 %731 }
 0x37f   :  { %v1129_v26 = vmax.f32 %v1127_v22, %v1128_v23  ;;  %2225 = vmatprep.mubr.msk.f32.mxu1 %vm389_vm1, %v732_v25 }
 0x380   :  { %v1060_v1 = vmax.f32 %v1058_v20, %v1059_v24  ;;  %v880_v20 = vld [vmem:[%s3261_s11] sm:$0xff] }
 0x381   :  { %v1130_v28 = vrot.slane %v1129_v26, 4 }
 0x382   :  { %v1061_v29 = vrot.slane %v1060_v1, 1  ;;  %v734_v31 = vpop.permute.xlu1 %733 }
 0x383   :  { %v1131_v32 = vmax.f32 %v1129_v26, %v1130_v28  ;;  %2226 = vmatmul.mubr.msk.f32.vlgmr.msra.gmra.mxu1 %vm389_vm1, %v734_v31 }
 0x384   :  { %2228 = vmatprep.mubr.msk.f32.mxu1 %vm389_vm1, %v736_v27  ;;  %v1062_v18 = vmax.f32 %v1060_v1, %v1061_v29  ;;  %2235 = vmatpush3.msra.mxu1 %v883_v14 }
 0x385   :  { %v1132_v33 = vrot.slane %v1131_v32, 2  ;;  %2236 = vmatprep.subr.mxu1 %v882_v17 }
 0x386   :  { %v738_v30 = vpop.permute.xlu1 %737  ;;  %vm1063_vm2 = vcmp.le.f32.partialorder %v1062_v18, -3e+38  ;;  %2237 = vmatpush3.msra.mxu1 %v882_v17 }
 0x387   :  { %v1133_v37 = vmax.f32 %v1131_v32, %v1132_v33  ;;  %2229 = vmatmul.mubr.msk.f32.gmra.mxu1 %vm389_vm1, %v738_v30  ;;  %v1064_v39 = vsel %vm1063_vm2, 0.0, %v1062_v18  ;;  %2238 = vmatprep.subr.mxu1 %v881_v60 }
 0x388   :  { %2231 = vmatprep.mubr.msk.f32.mxu1 %vm389_vm1, %v740_v36  ;;  %v1066_v40 = vsel %vm1005_vm11, %v1064_v39, 0.0  ;;  %v1065_v42 = vsel %vm1004_vm12, %v1064_v39, 0.0  ;;  %v1067_v49 = vsel %vm1006_vm14, %v1064_v39, 0.0  ;;  %v1068_v55 = vsel %vm1007_vm13, %v1064_v39, 0.0  ;;  %2239 = vmatpush3.msra.mxu1 %v881_v60 }
 0x389   :  { %v1134_v43 = vrot.slane %v1133_v37, 1  ;;  %v1074_v44 = vsel %vm108_vm0, %v1066_v40, 0.0  ;;  %v1071_v47 = vsel %vm108_vm0, %v1065_v42, 0.0  ;;  %v1077_v52 = vsel %vm108_vm0, %v1067_v49, 0.0  ;;  %2240 = vmatprep.subr.mxu1 %v880_v20 }
 0x38a   :  { %1075 = vadd.xlane.f32.xlu1 %v1074_v44  ;;  %1072 = vadd.xlane.f32.xlu0 %v1071_v47  ;;  %v742_v48 = vpop.permute.xlu1 %741  ;;  %v1080_v58 = vsel %vm108_vm0, %v1068_v55, 0.0  ;;  %v1069_v61 = vsel %vm1008_vm15, %v1064_v39, 0.0  ;;  %v1070_v2 = vsel %vm1009_vm10, %v1064_v39, 0.0 }
 0x38b   :  { %v1135_v51 = vmax.f32 %v1133_v37, %v1134_v43  ;;  %2232 = vmatmul.mubr.msk.f32.gmra.mxu1 %vm389_vm1, %v742_v48  ;;  %v1083_v63 = vsel %vm108_vm0, %v1069_v61, 0.0  ;;  %v1086_v6 = vsel %vm108_vm0, %v1070_v2, 0.0 }
 0x38c   :  { %2241 = vmatpush3.msra.mxu1 %v880_v20 }
 0x38d   :  { %vm1136_vm3 = vcmp.le.f32.partialorder %v1135_v51, -3e+38 }
 0x38e   :  { %1078 = vadd.xlane.f32.xlu1 %v1077_v52  ;;  %v1137_v53 = vsel %vm1136_vm3, 0.0, %v1135_v51 }
 0x38f   :  { %v1138_v56 = vsel %vm1004_vm12, %v1137_v53, 0.0  ;;  %v1139_v59 = vsel %vm1005_vm11, %v1137_v53, 0.0  ;;  %v1140_v0 = vsel %vm1006_vm14, %v1137_v53, 0.0  ;;  %v1141_v7 = vsel %vm1007_vm13, %v1137_v53, 0.0 }
 0x390   :  { %v1144_v57 = vsel %vm108_vm0, %v1138_v56, 0.0  ;;  %v1147_v62 = vsel %vm108_vm0, %v1139_v59, 0.0  ;;  %v1150_v5 = vsel %vm108_vm0, %v1140_v0, 0.0  ;;  %v1153_v9 = vsel %vm108_vm0, %v1141_v7, 0.0  ;;  %v1982_v59 = vld [vmem:[%s3260_s10] ss:$0 sm:$0xff] }
 0x391   :  { %1145 = vadd.xlane.f32.xlu0 %v1144_v57  ;;  %v1142_v10 = vsel %vm1008_vm15, %v1137_v53, 0.0  ;;  %v1143_v12 = vsel %vm1009_vm10, %v1137_v53, 0.0 }
 0x392   :  { %1081 = vadd.xlane.f32.xlu1 %v1080_v58  ;;  %v1156_v11 = vsel %vm108_vm0, %v1142_v10, 0.0  ;;  %v1159_v13 = vsel %vm108_vm0, %v1143_v12, 0.0 }
 0x395   :  { %1148 = vadd.xlane.f32.xlu0 %v1147_v62 }
 0x396   :  { %1084 = vadd.xlane.f32.xlu1 %v1083_v63 }
 0x399   :  { %1151 = vadd.xlane.f32.xlu0 %v1150_v5 }
 0x39a   :  { %1087 = vadd.xlane.f32.xlu1 %v1086_v6 }
 0x39d   :  { %1154 = vadd.xlane.f32.xlu0 %v1153_v9 }
 0x3a1   :  { %1157 = vadd.xlane.f32.xlu0 %v1156_v11 }
 0x3a5   :  { %1160 = vadd.xlane.f32.xlu0 %v1159_v13 }
 0x413   :  { %v1073_v21 = vpop.xlane.xlu0 %1072  ;;  %v1076_v22 = vpop.xlane.xlu1 %1075 }
 0x417   :  { %v1079_v25 = vpop.xlane.xlu1 %1078 }
 0x41a   :  { %v1146_v23 = vpop.xlane.xlu0 %1145 }
 0x41b   :  { %v1163_v24 = vsel %vm1162_vm4, %v1073_v21, %v1146_v23  ;;  %v1082_v31 = vpop.xlane.xlu1 %1081 }
 0x41c   :  { %v1169_v26 = vsub.f32 %v2853_v41, %v1163_v24 }
 0x41e   :  { %v1175_v1 = vmul.f32 1.442695, %v1169_v26  ;;  %v1149_v27 = vpop.xlane.xlu0 %1148 }
 0x41f   :  { %v1164_v28 = vsel %vm1162_vm4, %v1076_v22, %v1149_v27  ;;  %v1085_v37 = vpop.xlane.xlu1 %1084 }
 0x420   :  { %2377 = vpow2.f32 %v1175_v1  ;;  %v1170_v29 = vsub.f32 %v2848_v38, %v1164_v28 }
 0x422   :  { %v1177_v32 = vmul.f32 1.442695, %v1170_v29  ;;  %v1152_v18 = vpop.xlane.xlu0 %1151 }
 0x423   :  { %v1165_v33 = vsel %vm1162_vm4, %v1079_v25, %v1152_v18  ;;  %v1088_v43 = vpop.xlane.xlu1 %1087 }
 0x424   :  { %2379 = vpow2.f32 %v1177_v32  ;;  %v1171_v30 = vsub.f32 %v2862_v46, %v1165_v33 }
 0x426   :  { %v1155_v36 = vpop.xlane.xlu0 %1154  ;;  %v1179_v39 = vmul.f32 1.442695, %v1171_v30 }
 0x427   :  { %v1166_v41 = vsel %vm1162_vm4, %v1082_v31, %v1155_v36 }
 0x428   :  { %2381 = vpow2.f32 %v1179_v39  ;;  %v1172_v38 = vsub.f32 %v2860_v45, %v1166_v41 }
 0x42a   :  { %v1158_v40 = vpop.xlane.xlu0 %1157  ;;  %v1181_v51 = vmul.f32 1.442695, %v1172_v38 }
 0x42b   :  { %v1167_v45 = vsel %vm1162_vm4, %v1085_v37, %v1158_v40 }
 0x42c   :  { %v1173_v55 = vsub.f32 %v2875_v54, %v1167_v45 }
 0x42d   :  { %v3014_v42 = vpop.eup %2377 }
 0x42e   :  { %v1161_v44 = vpop.xlane.xlu0 %1160  ;;  %v1187_v47 = vadd.f32 1e-12, %v3014_v42 }
 0x42f   :  { %v1168_v48 = vsel %vm1162_vm4, %v1088_v43, %v1161_v44 }
 0x430   :  { %v1174_v49 = vsub.f32 %v2869_v50, %v1168_v48  ;;  %1195 = vperm.xlu1 %2355, %v1187_v47   ;;  %v1183_v50 = vmul.f32 1.442695, %v1173_v55 }
 0x431   :  { %v3020_v46 = vpop.eup %2379 }
 0x432   :  { %v1185_v52 = vmul.f32 1.442695, %v1174_v49  ;;  %v1188_v53 = vadd.f32 1e-12, %v3020_v46 }
 0x434   :  { %2383 = vpow2.f32 %v1185_v52  ;;  %2357 = vset.pattern.permute.xlu1 %v2466_v34  ;;  %1200 = vperm.xlu0 %2356, %v1188_v53  }
 0x435   :  { %1255 = vperm.xlu1 %2357, %v1187_v47   ;;  %2385 = vpow2.f32 %v1181_v51  ;;  %v2382_v56 = vpop.eup %2381 }
 0x436   :  { %v1189_v57 = vadd.f32 1e-12, %v2382_v56  ;;  %2387 = vpow2.f32 %v1183_v50 }
 0x439   :  { %1259 = vperm.xlu1 %2357, %v1188_v53  }
 0x43d   :  { %2358 = vset.pattern.permute.xlu1 %v2467_v35 }
 0x43e   :  { %1205 = vperm.xlu1 %2358, %v1189_v57  }
 0x441   :  { %v2384_v58 = vpop.eup %2383 }
 0x442   :  { %2359 = vset.pattern.permute.xlu1 %v2466_v34  ;;  %v1192_v61 = vadd.f32 1e-12, %v2384_v58  ;;  %v2386_v62 = vpop.eup %2385 }
 0x443   :  { %v2227_v63 = vpop.f32.mrf.mxu1  ;;  %1263 = vperm.xlu1 %2359, %v1189_v57   ;;  %v1190_v6 = vadd.f32 1e-12, %v2386_v62  ;;  %v2388_v20 = vpop.eup %2387 }
 0x444   :  { %v827_v54 = vadd.f32 %v2227_v63, %v1982_v59  ;;  %1220 = vperm.xlu0 %2356, %v1192_v61   ;;  %v1191_v25 = vadd.f32 1e-12, %v2388_v20 }
 0x445   :  { %v821_v0 = vpop.f32.mrf.mxu1 }
 0x446   :  { %v857_v2 = vmul.f32 0.70710677, %v827_v54  ;;  %v822_v5 = vadd.f32 %v1982_v59, %v821_v0  ;;  %v851_v32 = vmul.f32 0.5, %v827_v54 }
 0x447   :  { %v2230_v7 = vpop.f32.mrf.mxu1  ;;  %2360 = vset.pattern.permute.xlu1 %v2467_v35 }
 0x448   :  { %2389 = verf.f32 %v857_v2  ;;  %v856_v9 = vmul.f32 0.70710677, %v822_v5  ;;  %v837_v10 = vadd.f32 %v2230_v7, %v1982_v59  ;;  %1210 = vperm.xlu1 %2360, %v1190_v6   ;;  %2364 = vset.pattern.permute.xlu0 %v2466_v34  ;;  %v850_v28 = vmul.f32 0.5, %v822_v5 }
 0x449   :  { %v831_v11 = vpop.f32.mrf.mxu1 }
 0x44a   :  { %2391 = verf.f32 %v856_v9  ;;  %v859_v12 = vmul.f32 0.70710677, %v837_v10  ;;  %v832_v13 = vadd.f32 %v1982_v59, %v831_v11  ;;  %v853_v40 = vmul.f32 0.5, %v837_v10 }
 0x44b   :  { %v2233_v14 = vpop.f32.mrf.mxu1 }
 0x44c   :  { %2393 = verf.f32 %v859_v12  ;;  %v858_v17 = vmul.f32 0.70710677, %v832_v13  ;;  %v847_v60 = vadd.f32 %v2233_v14, %v1982_v59  ;;  %2361 = vset.pattern.permute.xlu1 %v2466_v34  ;;  %v852_v37 = vmul.f32 0.5, %v832_v13 }
 0x44d   :  { %v841_v21 = vpop.f32.mrf.mxu1  ;;  %1267 = vperm.xlu1 %2361, %v1190_v6  }
 0x44e   :  { %2395 = verf.f32 %v858_v17  ;;  %v861_v22 = vmul.f32 0.70710677, %v847_v60  ;;  %v842_v23 = vadd.f32 %v1982_v59, %v841_v21  ;;  %v855_v48 = vmul.f32 0.5, %v847_v60 }
 0x450   :  { %2397 = verf.f32 %v861_v22  ;;  %v860_v24 = vmul.f32 0.70710677, %v842_v23  ;;  %v854_v44 = vmul.f32 0.5, %v842_v23 }
 0x451   :  { %2362 = vset.pattern.permute.xlu1 %v2467_v35 }
 0x452   :  { %2399 = verf.f32 %v860_v24  ;;  %1215 = vperm.xlu1 %2362, %v1191_v25  }
 0x455   :  { %v2390_v26 = vpop.eup %2389 }
 0x456   :  { %2363 = vset.pattern.permute.xlu1 %v2466_v34  ;;  %v869_v27 = vadd.f32 1.0, %v2390_v26 }
 0x457   :  { %v2392_v1 = vpop.eup %2391  ;;  %1271 = vperm.xlu1 %2363, %v1191_v25  }
 0x458   :  { %v868_v29 = vadd.f32 1.0, %v2392_v1  ;;  %v875_v30 = vmul.f32 %v869_v27, %v851_v32 }
 0x459   :  { %v2394_v31 = vpop.eup %2393 }
 0x45a   :  { %v874_v18 = vmul.f32 %v868_v29, %v850_v28  ;;  %v871_v36 = vadd.f32 1.0, %v2394_v31 }
 0x45b   :  { %v2396_v33 = vpop.eup %2395  ;;  %1275 = vperm.xlu1 %2363, %v1192_v61  }
 0x45c   :  { %v870_v39 = vadd.f32 1.0, %v2396_v33  ;;  %2242 = vmatprep.mubr.msk.f32.mxu1 %vm389_vm1, %v874_v18  ;;  %v877_v43 = vmul.f32 %v871_v36, %v853_v40 }
 0x45d   :  { %v2398_v35 = vpop.eup %2397  ;;  %2243 = vmatmul.mubr.msk.f32.vlgmr.msra.gmra.mxu1 %vm389_vm1, %v875_v30 }
 0x45e   :  { %v876_v34 = vmul.f32 %v870_v39, %v852_v37  ;;  %v873_v38 = vadd.f32 1.0, %v2398_v35 }
 0x45f   :  { %v2400_v41 = vpop.eup %2399 }
 0x460   :  { %v872_v47 = vadd.f32 1.0, %v2400_v41  ;;  %2245 = vmatprep.mubr.msk.f32.mxu1 %vm389_vm1, %v876_v34  ;;  %v879_v51 = vmul.f32 %v873_v38, %v855_v48 }
 0x461   :  { %2246 = vmatmul.mubr.msk.f32.gmra.mxu1 %vm389_vm1, %v877_v43 }
 0x462   :  { %v878_v49 = vmul.f32 %v872_v47, %v854_v44 }
 0x464   :  { %2248 = vmatprep.mubr.msk.f32.mxu1 %vm389_vm1, %v878_v49 }
 0x465   :  { %2249 = vmatmul.mubr.msk.f32.gmra.mxu1 %vm389_vm1, %v879_v51 }
 0x466   :  { %2255 = vmatprep.mubr.msk.f32.mxu1 %vm108_vm0, %v2597_v3 }
 0x4ab   :  { %v1196_v52 = vpop.permute.xlu1 %1195 }
 0x4ac   :  { %v1223_v59 = vsel %vm1004_vm12, %v1196_v52, 0.0 }
 0x4ad   :  { %v1229_v0 = vsel %vm108_vm0, %v1223_v59, 0.0 }
 0x4af   :  { %v1201_v50 = vpop.permute.xlu0 %1200 }
 0x4b0   :  { %v1256_v53 = vpop.permute.xlu1 %1255  ;;  %v1224_v58 = vsel %vm1005_vm11, %v1201_v50, 0.0 }
 0x4b1   :  { %v1230_v62 = vsel %vm108_vm0, %v1224_v58, 0.0  ;;  %v1278_v11 = vsel %vm1004_vm12, %v1256_v53, 0.0 }
 0x4b2   :  { %v1231_v5 = vadd.f32 %v1230_v62, %v1229_v0  ;;  %v1284_v23 = vsel %vm108_vm0, %v1278_v11, 0.0 }
 0x4b4   :  { %v1260_v45 = vpop.permute.xlu1 %1259 }
 0x4b5   :  { %v1279_v6 = vsel %vm1005_vm11, %v1260_v45, 0.0 }
 0x4b6   :  { %v1285_v14 = vsel %vm108_vm0, %v1279_v6, 0.0 }
 0x4b7   :  { %v1286_v26 = vadd.f32 %v1285_v14, %v1284_v23 }
 0x4b9   :  { %v1206_v55 = vpop.permute.xlu1 %1205 }
 0x4ba   :  { %v1225_v61 = vsel %vm1006_vm14, %v1206_v55, 0.0 }
 0x4bb   :  { %v1232_v2 = vsel %vm108_vm0, %v1225_v61, 0.0 }
 0x4bc   :  { %v1233_v10 = vadd.f32 %v1232_v2, %v1231_v5 }
 0x4be   :  { %v1264_v56 = vpop.permute.xlu1 %1263 }
 0x4bf   :  { %v1221_v7 = vpop.permute.xlu0 %1220  ;;  %v1280_v12 = vsel %vm1006_vm14, %v1264_v56, 0.0 }
 0x4c0   :  { %v1228_v17 = vsel %vm1009_vm10, %v1221_v7, 0.0  ;;  %v1287_v24 = vsel %vm108_vm0, %v1280_v12, 0.0 }
 0x4c1   :  { %v1238_v1 = vsel %vm108_vm0, %v1228_v17, 0.0  ;;  %v1288_v31 = vadd.f32 %v1287_v24, %v1286_v26 }
 0x4c3   :  { %v1211_v57 = vpop.permute.xlu1 %1210 }
 0x4c4   :  { %v1226_v63 = vsel %vm1007_vm13, %v1211_v57, 0.0 }
 0x4c5   :  { %v1234_v9 = vsel %vm108_vm0, %v1226_v63, 0.0 }
 0x4c6   :  { %v1235_v60 = vadd.f32 %v1234_v9, %v1233_v10 }
 0x4c8   :  { %v1268_v54 = vpop.permute.xlu1 %1267 }
 0x4c9   :  { %v1281_v21 = vsel %vm1007_vm13, %v1268_v54, 0.0 }
 0x4ca   :  { %v1289_v27 = vsel %vm108_vm0, %v1281_v21, 0.0 }
 0x4cb   :  { %v1290_v30 = vadd.f32 %v1289_v27, %v1288_v31  ;;  %v1989_v31 = vld [vmem:[%s3262_s12] ss:$0 sm:$0xff] }
 0x4cd   :  { %v1216_v13 = vpop.permute.xlu1 %1215 }
 0x4ce   :  { %v1227_v20 = vsel %vm1008_vm15, %v1216_v13, 0.0 }
 0x4cf   :  { %v1236_v22 = vsel %vm108_vm0, %v1227_v20, 0.0 }
 0x4d0   :  { %v1237_v25 = vadd.f32 %v1236_v22, %v1235_v60 }
 0x4d2   :  { %v1239_v28 = vadd.f32 %v1238_v1, %v1237_v25  ;;  %v1272_v29 = vpop.permute.xlu1 %1271 }
 0x4d3   :  { %v1282_v32 = vsel %vm1008_vm15, %v1272_v29, 0.0 }
 0x4d4   :  { %v1240_v18 = vrot.slane %v1239_v28, 4  ;;  %v1291_v33 = vsel %vm108_vm0, %v1282_v32, 0.0 }
 0x4d5   :  { %v1292_v39 = vadd.f32 %v1291_v33, %v1290_v30 }
 0x4d6   :  { %v1241_v36 = vadd.f32 %v1240_v18, %v1239_v28  ;;  %v1276_v37 = vpop.permute.xlu1 %1275 }
 0x4d7   :  { %v1283_v35 = vsel %vm1009_vm10, %v1276_v37, 0.0 }
 0x4d8   :  { %v1293_v40 = vsel %vm108_vm0, %v1283_v35, 0.0  ;;  %v1242_v34 = vrot.slane %v1241_v36, 2 }
 0x4d9   :  { %v1294_v41 = vadd.f32 %v1293_v40, %v1292_v39 }
 0x4da   :  { %v1243_v43 = vadd.f32 %v1242_v34, %v1241_v36 }
 0x4db   :  { %v1295_v38 = vrot.slane %v1294_v41, 4 }
 0x4dc   :  { %v1244_v44 = vrot.slane %v1243_v43, 1 }
 0x4dd   :  { %v1296_v47 = vadd.f32 %v1295_v38, %v1294_v41 }
 0x4de   :  { %v1245_v48 = vadd.f32 %v1244_v44, %v1243_v43 }
 0x4df   :  { %v1297_v49 = vrot.slane %v1296_v47, 2 }
 0x4e0   :  { %v1247_v51 = vsel %vm1005_vm11, %v1245_v48, 0.0  ;;  %v1246_v45 = vsel %vm1004_vm12, %v1245_v48, 0.0 }
 0x4e1   :  { %v1251_v52 = vsel %vm108_vm0, %v1247_v51, 0.0  ;;  %v1298_v53 = vadd.f32 %v1297_v49, %v1296_v47  ;;  %v1248_v56 = vsel %vm108_vm0, %v1246_v45, 0.0 }
 0x4e2   :  { %1252 = vadd.xlane.f32.xlu0 %v1251_v52 }
 0x4e3   :  { %v1299_v55 = vrot.slane %v1298_v53, 1 }
 0x4e5   :  { %v1300_v50 = vadd.f32 %v1299_v55, %v1298_v53  ;;  %v2417_v55 = vld [vmem:[%s3288_s26] sm:$0xff] }
 0x4e6   :  { %1249 = vadd.xlane.f32.xlu0 %v1248_v56 }
 0x4e7   :  { %v1302_v57 = vsel %vm1005_vm11, %v1300_v50, 0.0  ;;  %v1301_v58 = vsel %vm1004_vm12, %v1300_v50, 0.0  ;;  %v2418_v50 = vld [vmem:[%s3288_s26 + $0x10] sm:$0xff] }
 0x4e8   :  { %v1306_v59 = vsel %vm108_vm0, %v1302_v57, 0.0  ;;  %v1303_v61 = vsel %vm108_vm0, %v1301_v58, 0.0 }
 0x4e9   :  { %1307 = vadd.xlane.f32.xlu1 %v1306_v59 }
 0x4ea   :  { %1304 = vadd.xlane.f32.xlu0 %v1303_v61 }
 0x56b   :  { %v1253_v62 = vpop.xlane.xlu0 %1252 }
 0x56f   :  { %v1250_v63 = vpop.xlane.xlu0 %1249 }
 0x572   :  { %v1308_v54 = vpop.xlane.xlu1 %1307 }
 0x573   :  { %v1310_v0 = vsel %vm1162_vm4, %v1253_v62, %v1308_v54  ;;  %v1305_v2 = vpop.xlane.xlu0 %1304 }
 0x574   :  { %2401 = vrcp.f32 %v1310_v0  ;;  %v1309_v5 = vsel %vm1162_vm4, %v1250_v63, %v1305_v2 }
 0x575   :  { %2403 = vrcp.f32 %v1309_v5 }
 0x581   :  { %v2402_v6 = vpop.eup %2401 }
 0x582   :  { %v2404_v7 = vpop.eup %2403  ;;  %v1314_v9 = vmul.f32 %v2402_v6, %v3020_v46 }
 0x583   :  { %v1313_v10 = vmul.f32 %v2404_v7, %v3014_v42  ;;  %v2244_v42 = vpop.f32.mrf.mxu1 }
 0x584   :  { %2251 = vmatprep.subr.mxu1 %v1314_v9  ;;  %v981_v41 = vadd.f32 %v2244_v42, %v1989_v31  ;;  %v1604_v42 = vld [vmem:[%s3263_s13 + $0x10] sm:$0xff] }
 0x585   :  { %2252 = vmatpush3.msra.mxu1 %v1314_v9  ;;  %v975_v46 = vpop.f32.mrf.mxu1 }
 0x586   :  { %2253 = vmatprep.subr.mxu1 %v1313_v10  ;;  %v976_v44 = vadd.f32 %v1989_v31, %v975_v46  ;;  %v1603_v46 = vld [vmem:[%s3263_s13 + $0x8] sm:$0xff] }
 0x587   :  { %2254 = vmatpush3.msra.mxu1 %v1313_v10  ;;  %v2247_v11 = vpop.f32.mrf.mxu1  ;;  %v1605_v10 = vld [vmem:[%s3263_s13 + $0x18] sm:$0xff] }
 0x588   :  { %2256 = vmatmul.mubr.msk.f32.vlgmr.msra.gmra.mxu1 %vm108_vm0, %v2599_v4  ;;  %v991_v39 = vadd.f32 %v2247_v11, %v1989_v31  ;;  %v1602_v11 = vld [vmem:[%s3263_s13] sm:$0xff] }
 0x589   :  { %2258 = vmatprep.mubr.msk.f32.mxu1 %vm108_vm0, %v2607_v8  ;;  %v985_v12 = vpop.f32.mrf.mxu1 }
 0x58b   :  { %v2250_v13 = vpop.f32.mrf.mxu1 }
 0x58c   :  { %2259 = vmatmul.mubr.msk.f32.gmra.mxu1 %vm108_vm0, %v2628_v15  ;;  %v1001_v18 = vadd.f32 %v2250_v13, %v1989_v31  ;;  %v1718_v13 = vld [vmem:[%s3265_s15 + $0x70] sm:$0xff] }
 0x58d   :  { %2261 = vmatprep.mubr.msk.f32.mxu1 %vm108_vm0, %v2632_v16  ;;  %v995_v14 = vpop.f32.mrf.mxu1 }
 0x590   :  { %2262 = vmatmul.mubr.msk.f32.gmra.mxu1 %vm108_vm0, %v2640_v19  ;;  %vm1473_vm0 = vcmask 392192  }
 0x648   :  { %v2257_v17 = vpop.f32.mrf.mxu1 }
 0x649   :  { %v1414_v1 = vsel %vm1410_vm5, %v2257_v17, 0.0 }
 0x64a   :  { %v1381_v60 = vpop.f32.mrf.mxu1 }
 0x64b   :  { %v1411_v28 = vsel %vm1410_vm5, %v1381_v60, 0.0 }
 0x64c   :  { %v2260_v20 = vpop.f32.mrf.mxu1 }
 0x64d   :  { %v1420_v21 = vsel %vm1410_vm5, %v2260_v20, 0.0 }
 0x64e   :  { %1421 = vadd.xlane.f32.xlu1 %v1420_v21  ;;  %v1391_v22 = vpop.f32.mrf.mxu1 }
 0x64f   :  { %v1417_v27 = vsel %vm1410_vm5, %v1391_v22, 0.0 }
 0x650   :  { %v2263_v23 = vpop.f32.mrf.mxu1 }
 0x651   :  { %v1426_v24 = vsel %vm1410_vm5, %v2263_v23, 0.0 }
 0x652   :  { %1427 = vadd.xlane.f32.xlu1 %v1426_v24  ;;  %v1401_v25 = vpop.f32.mrf.mxu1 }
 0x653   :  { %v1423_v26 = vsel %vm1410_vm5, %v1401_v25, 0.0  ;;  %v3155_v25 = vld [vmem:[%s3267_s17] ss:$0 sm:$0xff] }
 0x654   :  { %1424 = vadd.xlane.f32.xlu0 %v1423_v26 }
 0x656   :  { %1415 = vadd.xlane.f32.xlu1 %v1414_v1  ;;  %v3160_v1 = vld [vmem:[%s3268_s18] ss:$0 sm:$0xff] }
 0x658   :  { %1418 = vadd.xlane.f32.xlu0 %v1417_v27 }
 0x65c   :  { %1412 = vadd.xlane.f32.xlu0 %v1411_v28 }
 0x689   :  { %1441 = vxpose.xlu1.b32.start [1/6] (short) (narrow) %v2597_v3, 16  ;;  %v996_v3 = vadd.f32 %v1989_v31, %v995_v14  ;;  %v1717_v14 = vld [vmem:[%s3265_s15 + $0x68] sm:$0xff] }
 0x68d   :  { %1442 = vxpose.xlu1.b32.cont [2/6] (short) (narrow) %v2599_v4, 16 }
 0x691   :  { %1443 = vxpose.xlu1.b32.cont [3/6] (short) (narrow) %v2607_v8, 16 }
 0x695   :  { %1444 = vxpose.xlu1.b32.cont [4/6] (short) (narrow) %v2628_v15, 16 }
 0x699   :  { %1445 = vxpose.xlu1.b32.cont [5/6] (short) (narrow) %v2632_v16, 16 }
 0x69d   :  { %1446 = vxpose.xlu1.b32.end [6/6] (short) (narrow) %v2640_v19, 16  ;;  %v986_v19 = vadd.f32 %v1989_v31, %v985_v12  ;;  %v1719_v12 = vld [vmem:[%s3265_s15 + $0x78] sm:$0xff] }
 0x69e   :  { %2290 = vmatprep.subr.mxu1 %v1719_v12 }
 0x69f   :  { %2291 = vmatpush3.msra.mxu1 %v1719_v12 }
 0x6a0   :  { %2292 = vmatprep.subr.mxu1 %v1718_v13 }
 0x6a1   :  { %2293 = vmatpush3.msra.mxu1 %v1718_v13 }
 0x6a2   :  { %2294 = vmatprep.subr.mxu1 %v1717_v14 }
 0x6a3   :  { %2295 = vmatpush3.msra.mxu1 %v1717_v14 }
 0x6d7   :  { %v1422_v29 = vpop.xlane.xlu1 %1421 }
 0x6d8   :  { %v1432_v36 = vmul.f32 0.5, %v1422_v29 }
 0x6da   :  { %v1438_v35 = vmul.f32 %v1432_v36, %v991_v39  ;;  %v1713_v36 = vld [vmem:[%s3265_s15 + $0x48] sm:$0xff] }
 0x6db   :  { %v1428_v32 = vpop.xlane.xlu1 %1427  ;;  %v1709_v39 = vld [vmem:[%s3265_s15 + $0x28] sm:$0xff] }
 0x6dc   :  { %v1434_v33 = vmul.f32 0.5, %v1428_v32 }
 0x6dd   :  { %v1425_v30 = vpop.xlane.xlu0 %1424 }
 0x6de   :  { %v1440_v4 = vmul.f32 %v1434_v33, %v1001_v18  ;;  %v1433_v37 = vmul.f32 0.5, %v1425_v30  ;;  %v1716_v33 = vld [vmem:[%s3265_s15 + $0x60] sm:$0xff]  ;;  %v1715_v30 = vld [vmem:[%s3265_s15 + $0x58] sm:$0xff] }
 0x6df   :  { %v1416_v8 = vpop.xlane.xlu1 %1415  ;;  %2296 = vmatprep.subr.mxu1 %v1716_v33 }
 0x6e0   :  { %v1439_v15 = vmul.f32 %v1433_v37, %v996_v3  ;;  %2264 = vmatprep.subr.mxu0 %v1440_v4  ;;  %v1430_v40 = vmul.f32 0.5, %v1416_v8  ;;  %2297 = vmatpush3.msra.mxu1 %v1716_v33  ;;  %v1714_v3 = vld [vmem:[%s3265_s15 + $0x50] sm:$0xff]  ;;  %v1711_v37 = vld [vmem:[%s3265_s15 + $0x38] sm:$0xff] }
 0x6e1   :  { %2265 = vmatpush3.msra.mxu0 %v1440_v4  ;;  %v1419_v16 = vpop.xlane.xlu0 %1418  ;;  %2298 = vmatprep.subr.mxu1 %v1715_v30  ;;  %v1712_v4 = vld [vmem:[%s3265_s15 + $0x40] sm:$0xff]  ;;  %v1710_v8 = vld [vmem:[%s3265_s15 + $0x30] sm:$0xff] }
 0x6e2   :  { %v1431_v34 = vmul.f32 0.5, %v1419_v16  ;;  %2266 = vmatprep.subr.mxu0 %v1439_v15  ;;  %v1436_v47 = vmul.f32 %v1430_v40, %v981_v41  ;;  %2299 = vmatpush3.msra.mxu1 %v1715_v30  ;;  %v1707_v16 = vld [vmem:[%s3265_s15 + $0x18] sm:$0xff]  ;;  %v1704_v40 = vld [vmem:[%s3265_s15] sm:$0xff] }
 0x6e3   :  { %2267 = vmatpush3.msra.mxu0 %v1439_v15  ;;  %2300 = vmatprep.subr.mxu1 %v1714_v3  ;;  %v1708_v15 = vld [vmem:[%s3265_s15 + $0x20] sm:$0xff] }
 0x6e4   :  { %v1437_v43 = vmul.f32 %v1431_v34, %v986_v19  ;;  %2268 = vmatprep.subr.mxu0 %v1438_v35  ;;  %2301 = vmatpush3.msra.mxu1 %v1714_v3  ;;  %v1706_v19 = vld [vmem:[%s3265_s15 + $0x10] sm:$0xff]  ;;  %v2006_v34 = vld [vmem:[%s3264_s14] ss:$0 sm:$0xff] }
 0x6e5   :  { %2269 = vmatpush3.msra.mxu0 %v1438_v35  ;;  %v1413_v38 = vpop.xlane.xlu0 %1412  ;;  %2302 = vmatprep.subr.mxu1 %v1713_v36  ;;  %v1705_v35 = vld [vmem:[%s3265_s15 + $0x8] sm:$0xff] }
 0x6e6   :  { %v1429_v48 = vmul.f32 0.5, %v1413_v38  ;;  %2270 = vmatprep.subr.mxu0 %v1437_v43  ;;  %2303 = vmatpush3.msra.mxu1 %v1713_v36 }
 0x6e7   :  { %2271 = vmatpush3.msra.mxu0 %v1437_v43  ;;  %2304 = vmatprep.subr.mxu1 %v1712_v4 }
 0x6e8   :  { %v1435_v49 = vmul.f32 %v1429_v48, %v976_v44  ;;  %2272 = vmatprep.subr.mxu0 %v1436_v47  ;;  %2305 = vmatpush3.msra.mxu1 %v1712_v4 }
 0x6e9   :  { %2273 = vmatpush3.msra.mxu0 %v1436_v47  ;;  %2306 = vmatprep.subr.mxu1 %v1711_v37 }
 0x6ea   :  { %2274 = vmatprep.subr.mxu0 %v1435_v49  ;;  %2307 = vmatpush3.msra.mxu1 %v1711_v37 }
 0x6eb   :  { %2275 = vmatpush3.msra.mxu0 %v1435_v49  ;;  %2308 = vmatprep.subr.mxu1 %v1710_v8 }
 0x6ec   :  { %2279 = vmatprep.subr.mxu0 %v1605_v10  ;;  %2309 = vmatpush3.msra.mxu1 %v1710_v8 }
 0x6ed   :  { %2310 = vmatprep.subr.mxu1 %v1709_v39 }
 0x6ee   :  { %2311 = vmatpush3.msra.mxu1 %v1709_v39 }
 0x6ef   :  { %2312 = vmatprep.subr.mxu1 %v1708_v15 }
 0x6f0   :  { %2313 = vmatpush3.msra.mxu1 %v1708_v15 }
 0x6f1   :  { %2314 = vmatprep.subr.mxu1 %v1707_v16 }
 0x6f2   :  { %2315 = vmatpush3.msra.mxu1 %v1707_v16 }
 0x6f3   :  { %2316 = vmatprep.subr.mxu1 %v1706_v19 }
 0x6f4   :  { %2317 = vmatpush3.msra.mxu1 %v1706_v19 }
 0x6f5   :  { %2318 = vmatprep.subr.mxu1 %v1705_v35 }
 0x6f6   :  { %2319 = vmatpush3.msra.mxu1 %v1705_v35 }
 0x6f7   :  { %2320 = vmatprep.subr.mxu1 %v1704_v40 }
 0x6f8   :  { %2321 = vmatpush3.msra.mxu1 %v1704_v40 }
 0x705   :  { %v1457_v51 = vpop.trf.xlu1 }
 0x706   :  { %2276 = vmatprep.mubr.msk.f32.mxu0 %vm1473_vm0, %v1457_v51 }
 0x709   :  { %v1458_v52 = vpop.trf.xlu1 }
 0x70a   :  { %2277 = vmatmul.mubr.msk.f32.vlgmr.msra.gmra.mxu0 %vm1473_vm0, %v1458_v52 }
 0x70b   :  { %2280 = vmatpush3.msra.mxu0 %v1605_v10 }
 0x70c   :  { %2281 = vmatprep.subr.mxu0 %v1604_v42 }
 0x70d   :  { %2282 = vmatpush3.msra.mxu0 %v1604_v42 }
 0x70e   :  { %2283 = vmatprep.subr.mxu0 %v1603_v46 }
 0x70f   :  { %2284 = vmatpush3.msra.mxu0 %v1603_v46 }
 0x710   :  { %2285 = vmatprep.subr.mxu0 %v1602_v11 }
 0x711   :  { %2286 = vmatpush3.msra.mxu0 %v1602_v11 }
 0x7ca   :  { %v3115_v53 = vpop.f32.mrf.mxu0 }
 0x7cb   :  { %v1558_v57 = vadd.f32 %v2418_v50, %v3115_v53 }
 0x7cc   :  { %v3117_v45 = vpop.f32.mrf.mxu0 }
 0x7cd   :  { %v1557_v56 = vadd.f32 %v2417_v55, %v3117_v45  ;;  %v1562_v59 = vsel %vm389_vm1, %v1558_v57, 0.0 }
 0x7cf   :  { %v1559_v58 = vsel %vm389_vm1, %v1557_v56, 0.0 }
 0x7d0   :  { %1560 = vadd.xlane.f32.xlu0 %v1559_v58 }
 0x7d4   :  { %1563 = vadd.xlane.f32.xlu0 %v1562_v59 }
 0x859   :  { %v1561_v61 = vpop.xlane.xlu0 %1560 }
 0x85a   :  { %v1566_v62 = vmul.f32 0.03125, %v1561_v61  ;;  %v2009_v61 = vld [vmem:[%s3266_s16] ss:$0 sm:$0xff] }
 0x85c   :  { %v1568_v63 = vsub.f32 %v1557_v56, %v1566_v62 }
 0x85d   :  { %v1564_v54 = vpop.xlane.xlu0 %1563 }
 0x85e   :  { %v1567_v0 = vmul.f32 0.03125, %v1564_v54  ;;  %v1570_v2 = vmul.f32 %v1568_v63, %v1568_v63 }
 0x860   :  { %v1569_v5 = vsub.f32 %v1558_v57, %v1567_v0  ;;  %v1572_v6 = vsel %vm389_vm1, %v1570_v2, 0.0 }
 0x861   :  { %1573 = vadd.xlane.f32.xlu0 %v1572_v6 }
 0x862   :  { %v1571_v7 = vmul.f32 %v1569_v5, %v1569_v5 }
 0x864   :  { %v1575_v9 = vsel %vm389_vm1, %v1571_v7, 0.0 }
 0x865   :  { %1576 = vadd.xlane.f32.xlu0 %v1575_v9 }
 0x8ea   :  { %v1574_v17 = vpop.xlane.xlu0 %1573 }
 0x8eb   :  { %v1578_v60 = vmul.f32 0.03125, %v1574_v17  ;;  %v1838_v17 = vld [vmem:[%s3269_s19 + $0x10] sm:$0xff] }
 0x8ed   :  { %v1580_v20 = vadd.f32 1e-05, %v1578_v60  ;;  %v1837_v60 = vld [vmem:[%s3269_s19 + $0x8] sm:$0xff] }
 0x8ee   :  { %v1577_v21 = vpop.xlane.xlu0 %1576 }
 0x8ef   :  { %2405 = vrsqrt.f32 %v1580_v20  ;;  %v1579_v22 = vmul.f32 0.03125, %v1577_v21  ;;  %v1836_v20 = vld [vmem:[%s3269_s19] sm:$0xff] }
 0x8f1   :  { %v1581_v23 = vadd.f32 1e-05, %v1579_v22 }
 0x8f3   :  { %2407 = vrsqrt.f32 %v1581_v23 }
 0x8fc   :  { %v2406_v24 = vpop.eup %2405 }
 0x8fd   :  { %v1584_v26 = vmul.f32 %v2406_v24, %v1568_v63 }
 0x8ff   :  { %v1592_v27 = vmul.f32 %v3155_v25, %v1584_v26 }
 0x900   :  { %v2408_v28 = vpop.eup %2407 }
 0x901   :  { %v1585_v29 = vmul.f32 %v2408_v28, %v1569_v5  ;;  %v1600_v31 = vadd.f32 %v3160_v1, %v1592_v27 }
 0x903   :  { %2287 = vmatprep.mubr.msk.f32.mxu0 %vm389_vm1, %v1600_v31  ;;  %v1593_v32 = vmul.f32 %v3155_v25, %v1585_v29 }
 0x905   :  { %v1601_v18 = vadd.f32 %v3160_v1, %v1593_v32 }
 0x907   :  { %2288 = vmatmul.mubr.msk.f32.vlgmr.msra.gmra.mxu0 %vm389_vm1, %v1601_v18 }
 0x9c7   :  { %v2289_v41 = vpop.f32.mrf.mxu0 }
 0x9c8   :  { %v1691_v43 = vadd.f32 %v2289_v41, %v2006_v34 }
 0x9c9   :  { %v1685_v38 = vpop.f32.mrf.mxu0 }
 0x9ca   :  { %v1697_v44 = vmul.f32 0.70710677, %v1691_v43  ;;  %v1686_v47 = vadd.f32 %v2006_v34, %v1685_v38  ;;  %v1695_v50 = vmul.f32 0.5, %v1691_v43 }
 0x9cc   :  { %2409 = verf.f32 %v1697_v44  ;;  %v1696_v48 = vmul.f32 0.70710677, %v1686_v47  ;;  %v1694_v55 = vmul.f32 0.5, %v1686_v47 }
 0x9ce   :  { %2411 = verf.f32 %v1696_v48 }
 0x9d9   :  { %v2410_v49 = vpop.eup %2409 }
 0x9da   :  { %v1701_v52 = vadd.f32 1.0, %v2410_v49 }
 0x9db   :  { %v2412_v51 = vpop.eup %2411 }
 0x9dc   :  { %v1700_v56 = vadd.f32 1.0, %v2412_v51  ;;  %v1703_v58 = vmul.f32 %v1701_v52, %v1695_v50 }
 0x9de   :  { %v1702_v57 = vmul.f32 %v1700_v56, %v1694_v55 }
 0x9e0   :  { %2322 = vmatprep.mubr.f32.mxu1 %v1702_v57 }
 0x9e1   :  { %2323 = vmatmul.mubr.f32.vlgmr.msra.gmra.mxu1 %v1703_v58 }
 0xaa1   :  { %v2324_v59 = vpop.f32.mrf.mxu1 }
 0xaa2   :  { %v1799_v63 = vadd.f32 %v2324_v59, %v2009_v61 }
 0xaa3   :  { %v1793_v62 = vpop.f32.mrf.mxu1 }
 0xaa4   :  { %v1794_v54 = vadd.f32 %v2009_v61, %v1793_v62  ;;  %v1803_v5 = vadd.f32 %v3115_v53, %v1799_v63  ;;  %v1839_v53 = vld [vmem:[%s3269_s19 + $0x18] sm:$0xff]  ;;  %s2469_s19 = smov [#allocation2]  }
 0xaa5   :  { %2325 = vmatprep.subr.mxu0 %v1839_v53  ;;  %s1935_s9 = sshll.u32 %s2469_s19, 4  ;;  %s1936_s9 = int_to_ptr.vmem [resolvable:$true] %s1935_s9 }
 0xaa6   :  { %v1802_v0 = vadd.f32 %v1794_v54, %v3117_v45  ;;  %v1807_v6 = vsel %vm389_vm1, %v1803_v5, 0.0  ;;  %2326 = vmatpush3.msra.mxu0 %v1839_v53  ;;  %s2419_s3 = scalar_lea.vmem %s1936_s9, 256  ;;  %p2424_p1 = scmp.lt.s32.totalorder %s1936_s9, %s1936_s9 }
 0xaa7   :  { %2327 = vmatprep.subr.mxu0 %v1838_v17  ;;  %p2420_p0 = scmp.ne.s32.totalorder %s1936_s9, %s2419_s3  ;;  %p2425_p2 = scmp.lt.s32.totalorder %s2419_s3, %s2419_s3 }
 0xaa8   :  { %v1804_v2 = vsel %vm389_vm1, %v1802_v0, 0.0  ;;  %2328 = vmatpush3.msra.mxu0 %v1838_v17 }
 0xaa9   :  { %1805 = vadd.xlane.f32.xlu0 %v1804_v2  ;;  %2329 = vmatprep.subr.mxu0 %v1837_v60  ;;  %p2426_p3 = por %p2425_p2, %p2424_p1 }
 0xaaa   :  { %2330 = vmatpush3.msra.mxu0 %v1837_v60 }
 0xaab   :  { %2331 = vmatprep.subr.mxu0 %v1836_v20  ;;  %p2427_p4 = pnand %p2426_p3, %p2420_p0 }
 0xaac   :  { %2332 = vmatpush3.msra.mxu0 %v1836_v20 }
 0xaad   :  { %1808 = vadd.xlane.f32.xlu0 %v1807_v6 }
 0xb32   :  { %v1806_v7 = vpop.xlane.xlu0 %1805 }
 0xb33   :  { %v1810_v9 = vmul.f32 0.03125, %v1806_v7 }
 0xb35   :  { %v1812_v10 = vsub.f32 %v1802_v0, %v1810_v9 }
 0xb36   :  { %v1809_v42 = vpop.xlane.xlu0 %1808 }
 0xb37   :  { %v1811_v46 = vmul.f32 0.03125, %v1809_v42  ;;  %v1814_v11 = vmul.f32 %v1812_v10, %v1812_v10 }
 0xb39   :  { %v1813_v12 = vsub.f32 %v1803_v5, %v1811_v46  ;;  %v1816_v13 = vsel %vm389_vm1, %v1814_v11, 0.0 }
 0xb3a   :  { %1817 = vadd.xlane.f32.xlu0 %v1816_v13 }
 0xb3b   :  { %v1815_v14 = vmul.f32 %v1813_v12, %v1813_v12 }
 0xb3d   :  { %v1819_v45 = vsel %vm389_vm1, %v1815_v14, 0.0 }
 0xb3e   :  { %1820 = vadd.xlane.f32.xlu0 %v1819_v45 }
 0xbc3   :  { %v1818_v21 = vpop.xlane.xlu0 %1817 }
 0xbc4   :  { %v1822_v22 = vmul.f32 0.03125, %v1818_v21 }
 0xbc6   :  { %v1824_v23 = vadd.f32 1e-05, %v1822_v22 }
 0xbc7   :  { %v1821_v24 = vpop.xlane.xlu0 %1820 }
 0xbc8   :  { %2413 = vrsqrt.f32 %v1824_v23  ;;  %v1823_v26 = vmul.f32 0.03125, %v1821_v24 }
 0xbca   :  { %v1825_v27 = vadd.f32 1e-05, %v1823_v26 }
 0xbcc   :  { %2415 = vrsqrt.f32 %v1825_v27 }
 0xbd5   :  { %v2414_v28 = vpop.eup %2413 }
 0xbd6   :  { %v1828_v29 = vmul.f32 %v2414_v28, %v1812_v10 }
 0xbd8   :  { %v1830_v31 = vmul.f32 %v3155_v25, %v1828_v29 }
 0xbd9   :  { %v2416_v32 = vpop.eup %2415 }
 0xbda   :  { %v1829_v18 = vmul.f32 %v2416_v32, %v1813_v12  ;;  %v1832_v33 = vadd.f32 %v3160_v1, %v1830_v31 }
 0xbdc   :  { %2333 = vmatprep.mubr.msk.f32.mxu0 %vm389_vm1, %v1832_v33  ;;  %1834 = vst.msk [vmem:[#allocation2] sm:$0xff] %vm389_vm1, %v1832_v33  ;;  %v1831_v30 = vmul.f32 %v3155_v25, %v1829_v18 }
 0xbde   :  { %v1833_v3 = vadd.f32 %v3160_v1, %v1831_v30 }
 0xbe0   :  { %2334 = vmatmul.mubr.msk.f32.vlgmr.msra.gmra.mxu0 %vm389_vm1, %v1833_v3  ;;  %1835 = vst.msk [vmem:[#allocation2 + $0x8] sm:$0xff] %vm389_vm1, %v1833_v3 }
 0xbe1   :  { %2430 = shalt.err (!%p2427_p4)
}
 0xbe2   :  { %s2470_s30 = smov 128   ;;  %s2471_s2 = smov 8   ;;  %v2010_v25 = vld [vmem:[%s3270_s20] ss:$0 sm:$0xff] }
 0xbe3   :  { %1941 = dma.vmem_to_hbm [thread:$0]  %s1936_s9, 256, %s3271_s21, [#allocation3], %s2470_s30, %s2470_s30, %s2471_s2  }
 0xbe4   :  { %s2472_s11 = smov [#allocation4]  }
 0xbe5   :  { %s1947_s13 = sshll.u32 %s2472_s11, 4  ;;  %s1948_s13 = int_to_ptr.vmem [resolvable:$true] %s1947_s13 }
 0xbe6   :  { %s2439_s8 = scalar_lea.vmem %s1948_s13, 256  ;;  %p2444_p6 = scmp.lt.s32.totalorder %s1948_s13, %s1948_s13 }
 0xbe7   :  { %p2440_p5 = scmp.ne.s32.totalorder %s1948_s13, %s2439_s8  ;;  %p2445_p7 = scmp.lt.s32.totalorder %s2439_s8, %s2439_s8 }
 0xbe9   :  { %p2446_p8 = por %p2445_p7, %p2444_p6 }
 0xbeb   :  { %p2447_p9 = pnand %p2446_p8, %p2440_p5 }
 0xca0   :  { %v2335_v1 = vpop.f32.mrf.mxu0 }
 0xca1   :  { %v1925_v36 = vadd.f32 %v2335_v1, %v2010_v25 }
 0xca2   :  { %v1919_v4 = vpop.f32.mrf.mxu0 }
 0xca3   :  { %1929 = vst.msk [vmem:[#allocation4 + $0x8] sm:$0xff] %vm389_vm1, %v1925_v36  ;;  %v1920_v37 = vadd.f32 %v2010_v25, %v1919_v4 }
 0xca5   :  { %1928 = vst.msk [vmem:[#allocation4] sm:$0xff] %vm389_vm1, %v1920_v37 }
 0xca6   :  { %2450 = shalt.err (!%p2447_p9)
}
 0xca7   :  { %1953 = dma.vmem_to_hbm [thread:$0]  %s1948_s13, 256, %s3272_s22, [#allocation5], %s2470_s30, %s2470_s30, %s2471_s2  }
 0xca8   :  { %2459 = dma.done.wait [#allocation3], 256  }
 0xca9   :  { %2460 = vsyncadd [#allocation3], 4294967040 }
 0xcaa   :  { %2461 = dma.done.wait [#allocation5], 256  }
 0xcab   :  { %2462 = vsyncadd [#allocation5], 4294967040 }
 0xcac   :  { %1960 = vsyncpa [#allocation3], 1 }
 0xcad   :  { %1961 = vsyncpa [#allocation5], 1 }

</bundles_post_ra>
